<compile_context>
chip_gen: v7x
topology: tpu7x:2x2x1
jax: 0.10.0
libtpu: 0.0.40
codegen_flags: <defaults>
</compile_context>

<pallas_src>
import math

import numpy as np
import jax
import jax.numpy as jnp
from jax import lax
from jax.experimental import pallas as pl
from jax.experimental.pallas import tpu as pltpu


# ---------------------------------------------------------------------------
# Fused kernel: spatial conv (folded) + avg-pool + fused pointwise/bias heads
# ---------------------------------------------------------------------------
def _kernel_predictor_kernel(wflat_ref, wsp_ref, pmat_ref, whead_ref, bias_ref,
                             out_ref):
    prec = lax.Precision.HIGHEST
    wflat = wflat_ref[...]                                   # (N, S*Hw*Ww)

    # spatial head: reflect-pad conv == one folded matmul, columns already in
    # (c, oy, ox) order and lane-padded into the packed output slab.
    spatial = jnp.dot(wflat, wsp_ref[...],
                      preferred_element_type=jnp.float32, precision=prec)

    # AdaptiveAvgPool2d((1,1)) on the same VMEM buffer (constant matmul).
    pooled = jnp.dot(wflat, pmat_ref[...],
                     preferred_element_type=jnp.float32, precision=prec)

    # fused pointwise + bias heads (single matmul into their lane range).
    heads = jnp.dot(pooled, whead_ref[...],
                    preferred_element_type=jnp.float32, precision=prec)

    # single lane-dense store (one writeback DMA for all three results).
    out_ref[...] = spatial + heads + bias_ref[...]


# ---------------------------------------------------------------------------
# One-time parameter preparation (hoisted out of the per-call path)
# ---------------------------------------------------------------------------
def _reflect_index_map(pad, size):
    """Original-axis index for each position of a reflect-padded axis."""
    assert pad <= size - 1, "reflect padding requires pad < input size"
    idx = []
    for p in range(size + 2 * pad):
        i = p - pad
        if i < 0:
            i = -i
        elif i >= size:
            i = 2 * size - 2 - i
        idx.append(i)
    return idx


def prepare_kernel_predictor_params(spatial_w, spatial_b, pw_w, pw_b, b_w, b_b,
                                    *, in_channels, out_channels, n_groups,
                                    style_channels, kernel_size, style_hw):
    S = style_channels
    K = kernel_size
    Hw, Ww = style_hw
    C_sp = in_channels * out_channels // n_groups
    C_pw = out_channels * out_channels // n_groups
    C_b = out_channels

    pc = math.ceil((K - 1) / 2)
    Ho = Hw + 2 * pc - (K - 1)
    Wo = Ww + 2 * pc - (K - 1)
    rmap = _reflect_index_map(pc, Hw)
    cmap = _reflect_index_map(pc, Ww)

    # Fold reflect-pad + im2col into the spatial conv weight (exact, float64).
    wt = np.asarray(spatial_w, dtype=np.float64).reshape(C_sp, S, K, K)
    weff = np.zeros((S, Hw, Ww, C_sp, Ho, Wo), dtype=np.float64)
    for oy in range(Ho):
        for dy in range(K):
            qy = rmap[oy + dy]
            for ox in range(Wo):
                for dx in range(K):
                    qx = cmap[ox + dx]
                    weff[:, qy, qx, :, oy, ox] += wt[:, :, dy, dx].T
    wsp = weff.reshape(S * Hw * Ww, C_sp * Ho * Wo)   # rows (s,qy,qx), cols (c,oy,ox)

    # AdaptiveAvgPool2d((1,1)) as a constant matrix, pooled heads fused.
    pmat = np.kron(np.eye(S), np.ones((Hw * Ww, 1)) / (Hw * Ww))        # (S*Hw*Ww, S)
    whead = np.concatenate(
        [np.asarray(pw_w, np.float64).reshape(C_pw, S),
         np.asarray(b_w, np.float64).reshape(C_b, S)], axis=0).T        # (S, C_pw+C_b)
    bhead = np.concatenate([np.asarray(pw_b, np.float64).reshape(C_pw),
                            np.asarray(b_b, np.float64).reshape(C_b)])

    # Pack everything into one lane-dense output slab of width `lanes`.
    n_sp = C_sp * Ho * Wo
    n_head = C_pw + C_b
    n_cols = n_sp + n_head
    lanes = ((n_cols + 127) // 128) * 128

    wsp_pad = np.zeros((S * Hw * Ww, lanes), np.float32)
    wsp_pad[:, :n_sp] = wsp
    whead_pad = np.zeros((S, lanes), np.float32)
    whead_pad[:, n_sp:n_cols] = whead
    bias_pad = np.zeros((1, lanes), np.float32)
    bias_pad[0, :n_sp] = np.repeat(np.asarray(spatial_b, np.float64), Ho * Wo)
    bias_pad[0, n_sp:n_cols] = bhead

    return dict(
        wsp=jnp.asarray(wsp_pad),
        pmat=jnp.asarray(pmat, dtype=jnp.float32),
        whead=jnp.asarray(whead_pad),
        bias=jnp.asarray(bias_pad),
        n_sp=n_sp, lanes=lanes, Ho=Ho, Wo=Wo,
        C_sp=C_sp, C_pw=C_pw, C_b=C_b)


# ---------------------------------------------------------------------------
# Per-call wrapper: free reshape in, one pallas_call, slice the packed slab
# ---------------------------------------------------------------------------
def kernel_predictor_forward(w, params, *, in_channels, out_channels, n_groups,
                             kernel_size):
    N, S, Hw, Ww = w.shape
    K = kernel_size
    Ho, Wo = params["Ho"], params["Wo"]
    C_sp, C_pw, C_b = params["C_sp"], params["C_pw"], params["C_b"]
    n_sp, lanes = params["n_sp"], params["lanes"]

    # The PyTorch reshape silently assumes the conv output has K*K spatial
    # positions (AdaConv convention: style spatial size == kernel_size, odd K).
    assert C_sp * Ho * Wo == out_channels * (in_channels // n_groups) * K * K, (
        "KernelPredictor reshape requires the style spatial size to equal "
        "kernel_size (odd K)")

    wflat = w.reshape(N, S * Hw * Ww).astype(jnp.float32)   # free view

    vmem = pl.BlockSpec(memory_space=pltpu.MemorySpace.VMEM)
    out = pl.pallas_call(
        _kernel_predictor_kernel,
        out_shape=jax.ShapeDtypeStruct((N, lanes), jnp.float32),
        in_specs=[vmem, vmem, vmem, vmem, vmem],
        out_specs=vmem,
    )(wflat, params["wsp"], params["pmat"], params["whead"], params["bias"])

    w_spatial = out[:, :n_sp].reshape(
        N, out_channels, in_channels // n_groups, K, K)
    w_pointwise = out[:, n_sp:n_sp + C_pw].reshape(
        N, out_channels, out_channels // n_groups, 1, 1)
    bias = out[:, n_sp + C_pw:n_sp + C_pw + C_b].reshape(N, out_channels)
    return w_spatial, w_pointwise, bias


# ---------------------------------------------------------------------------
# Pure-JAX reference (mirrors the PyTorch forward exactly)
# ---------------------------------------------------------------------------
def reference_forward(w, spatial_w, spatial_b, pw_w, pw_b, b_w, b_b,
                      *, in_channels, out_channels, n_groups, kernel_size):
    N, S, Hw, Ww = w.shape
    K = kernel_size
    pc = math.ceil((K - 1) / 2)
    dn = ("NCHW", "OIHW", "NCHW")
    prec = lax.Precision.HIGHEST

    wpad = jnp.pad(w, ((0, 0), (0, 0), (pc, pc), (pc, pc)), mode="reflect")
    ws = lax.conv_general_dilated(wpad, spatial_w, (1, 1), "VALID",
                                  dimension_numbers=dn, precision=prec)
    ws = ws + spatial_b[None, :, None, None]
    w_spatial = ws.reshape(N, out_channels, in_channels // n_groups, K, K)

    pooled = w.mean(axis=(2, 3))                                  # (N, S)
    ypw = jnp.dot(pooled, pw_w.reshape(-1, S).T, precision=prec) + pw_b
    w_pointwise = ypw.reshape(N, out_channels, out_channels // n_groups, 1, 1)
    yb = jnp.dot(pooled, b_w.reshape(-1, S).T, precision=prec) + b_b
    bias = yb.reshape(N, out_channels)
    return w_spatial, w_pointwise, bias


if __name__ == "__main__":
    key = jax.random.PRNGKey(0)

    # AdaConv-style config: the style descriptor's spatial size == kernel_size.
    N = 2
    style_channels = 32
    in_channels = 8
    out_channels = 8
    n_groups = 4
    kernel_size = 3

    C_sp = in_channels * out_channels // n_groups    # 16
    C_pw = out_channels * out_channels // n_groups   # 16

    ks = jax.random.split(key, 7)
    w = jax.random.normal(ks[0], (N, style_channels, kernel_size, kernel_size),
                          jnp.float32)

    # deterministic "module parameters" (Conv2d-style uniform init)
    fan_sp = style_channels * kernel_size * kernel_size
    bnd_sp = 1.0 / math.sqrt(fan_sp)
    spatial_w = jax.random.uniform(
        ks[1], (C_sp, style_channels, kernel_size, kernel_size),
        jnp.float32, -bnd_sp, bnd_sp)
    spatial_b = jax.random.uniform(ks[2], (C_sp,), jnp.float32, -bnd_sp, bnd_sp)

    bnd_1 = 1.0 / math.sqrt(style_channels)
    pw_w = jax.random.uniform(ks[3], (C_pw, style_channels, 1, 1),
                              jnp.float32, -bnd_1, bnd_1)
    pw_b = jax.random.uniform(ks[4], (C_pw,), jnp.float32, -bnd_1, bnd_1)
    b_w = jax.random.uniform(ks[5], (out_channels, style_channels, 1, 1),
                             jnp.float32, -bnd_1, bnd_1)
    b_b = jax.random.uniform(ks[6], (out_channels,), jnp.float32, -bnd_1, bnd_1)

    # one-time parameter prep (folded weights, packed layouts) -- init path
    params = prepare_kernel_predictor_params(
        spatial_w, spatial_b, pw_w, pw_b, b_w, b_b,
        in_channels=in_channels, out_channels=out_channels, n_groups=n_groups,
        style_channels=style_channels, kernel_size=kernel_size,
        style_hw=(kernel_size, kernel_size))

    fwd = jax.jit(lambda x: kernel_predictor_forward(
        x, params, in_channels=in_channels, out_channels=out_channels,
        n_groups=n_groups, kernel_size=kernel_size))

    w_spatial, w_pointwise, bias = jax.block_until_ready(fwd(w))

    ref_sp, ref_pw, ref_b = reference_forward(
        w, spatial_w, spatial_b, pw_w, pw_b, b_w, b_b,
        in_channels=in_channels, out_channels=out_channels,
        n_groups=n_groups, kernel_size=kernel_size)

    assert w_spatial.shape == (N, out_channels, in_channels // n_groups,
                               kernel_size, kernel_size), w_spatial.shape
    assert w_pointwise.shape == (N, out_channels, out_channels // n_groups,
                                 1, 1), w_pointwise.shape
    assert bias.shape == (N, out_channels), bias.shape

    max_err = max(float(jnp.max(jnp.abs(w_spatial - ref_sp))),
                  float(jnp.max(jnp.abs(w_pointwise - ref_pw))),
                  float(jnp.max(jnp.abs(bias - ref_b))))
    if max_err > 1e-3:
        raise AssertionError(f"Pallas output mismatch vs reference: {max_err}")

    print("KERNEL_OK")
</pallas_src>

<mosaic_0001>
module attributes {stable_mosaic.version = 11 : i64} {
  func.func @_kernel_predictor_kernel(%arg0: memref<2x288xf32, #tpu.memory_space<vmem>>, %arg1: memref<288x256xf32, #tpu.memory_space<vmem>>, %arg2: memref<288x32xf32, #tpu.memory_space<vmem>>, %arg3: memref<32x256xf32, #tpu.memory_space<vmem>>, %arg4: memref<1x256xf32, #tpu.memory_space<vmem>>, %arg5: memref<2x256xf32, #tpu.memory_space<vmem>>) attributes {dimension_semantics = [], scalar_prefetch = 0 : i64, scratch_operands = 0 : i64, tpu.core_type = #tpu.core_type<tc>} {
    %c0 = arith.constant 0 : index
    %c0_0 = arith.constant 0 : index
    %0 = vector.load %arg0[%c0, %c0_0] : memref<2x288xf32, #tpu.memory_space<vmem>>, vector<2x288xf32>
    %c0_1 = arith.constant 0 : index
    %c0_2 = arith.constant 0 : index
    %1 = vector.load %arg1[%c0_1, %c0_2] : memref<288x256xf32, #tpu.memory_space<vmem>>, vector<288x256xf32>
    %cst = arith.constant dense<0.000000e+00> : vector<2x256xf32>
    %2 = tpu.matmul %0, %1, %cst {dimension_numbers = #tpu.dot_dimension_numbers<[1], [0], [0], [1], [0, 0, 1, 1], [], []>, precision = #tpu.contract_precision<fp32>} : vector<2x288xf32>, vector<288x256xf32>, vector<2x256xf32> -> vector<2x256xf32>
    %c0_3 = arith.constant 0 : index
    %c0_4 = arith.constant 0 : index
    %3 = vector.load %arg2[%c0_3, %c0_4] : memref<288x32xf32, #tpu.memory_space<vmem>>, vector<288x32xf32>
    %cst_5 = arith.constant dense<0.000000e+00> : vector<2x32xf32>
    %4 = tpu.matmul %0, %3, %cst_5 {dimension_numbers = #tpu.dot_dimension_numbers<[1], [0], [0], [1], [0, 0, 1, 1], [], []>, precision = #tpu.contract_precision<fp32>} : vector<2x288xf32>, vector<288x32xf32>, vector<2x32xf32> -> vector<2x32xf32>
    %c0_6 = arith.constant 0 : index
    %c0_7 = arith.constant 0 : index
    %5 = vector.load %arg3[%c0_6, %c0_7] : memref<32x256xf32, #tpu.memory_space<vmem>>, vector<32x256xf32>
    %cst_8 = arith.constant dense<0.000000e+00> : vector<2x256xf32>
    %6 = tpu.matmul %4, %5, %cst_8 {dimension_numbers = #tpu.dot_dimension_numbers<[1], [0], [0], [1], [0, 0, 1, 1], [], []>, precision = #tpu.contract_precision<fp32>} : vector<2x32xf32>, vector<32x256xf32>, vector<2x256xf32> -> vector<2x256xf32>
    %7 = arith.addf %2, %6 : vector<2x256xf32>
    %c0_9 = arith.constant 0 : index
    %c0_10 = arith.constant 0 : index
    %8 = vector.load %arg4[%c0_9, %c0_10] : memref<1x256xf32, #tpu.memory_space<vmem>>, vector<1x256xf32>
    %9 = vector.broadcast %8 : vector<1x256xf32> to vector<2x256xf32>
    %10 = arith.addf %7, %9 : vector<2x256xf32>
    %c0_11 = arith.constant 0 : index
    %c0_12 = arith.constant 0 : index
    %11 = vector.load %arg5[%c0_11, %c0_12] : memref<2x256xf32, #tpu.memory_space<vmem>>, vector<2x256xf32>
    tpu.vector_store %arg5[%c0_11, %c0_12], %10 {strides = array<i32>} : memref<2x256xf32, #tpu.memory_space<vmem>>, vector<2x256xf32>,
    return
  }
}

</mosaic_0001>

<bundles_post_ra>
// kernel: _lambda_.1
= control target key start
LH: loop header
LB: loop body
LE: loop exit
PB: predicated region body
PF: predicated region fallthrough
CT: control target
= control target key end

     0   :  { %10 = vsyncpa [#allocation3], 0  ;;  %s5015_s18 = smov [#allocation2]   ;;  %s6863_s0 = inlined_call_operand.vmem [shape: f32[2,288], index: 0, kind: input, shape index: {}]   ;;  %s6864_s1 = inlined_call_operand.hbm [shape: f32[288,256], index: 1, kind: input, shape index: {}]   ;;  %s6865_s2 = inlined_call_operand.vmem [shape: f32[288,32], index: 2, kind: input, shape index: {}]   ;;  %s6866_s3 = inlined_call_operand.vmem [shape: f32[32,256], index: 3, kind: input, shape index: {}]   ;;  %s6867_s4 = inlined_call_operand.vmem [shape: f32[1,256], index: 4, kind: input, shape index: {}]   ;;  %s6868_s5 = inlined_call_operand.vmem [shape: f32[2,256], index: 5, kind: output, shape index: {}]  }
   0x1   :  { %s18_s19 = sshll.u32 %s5015_s18, 4  ;;  %s4991_s22 = scalar_lea.hbm %s6864_s1, 9216  ;;  %s19_s19 = int_to_ptr.vmem [resolvable:$true] %s18_s19 }
   0x2   :  { %p4992_p0 = scmp.ne.s32.totalorder %s6864_s1, %s4991_s22  ;;  %p4995_p1 = scmp.lt.u32.totalorder %s4991_s22, %s6864_s1 }
   0x4   :  { %p4997_p2 = pnand %p4995_p1, %p4992_p0 }
   0x6   :  { %5000 = shalt.err (!%p4997_p2)
}
   0x7   :  { %s5001_s27 = scalar_lea.vmem %s19_s19, 9216  ;;  %p5006_p4 = scmp.lt.s32.totalorder %s19_s19, %s19_s19 }
   0x8   :  { %p5002_p3 = scmp.ne.s32.totalorder %s19_s19, %s5001_s27  ;;  %p5007_p5 = scmp.lt.s32.totalorder %s5001_s27, %s5001_s27 }
   0xa   :  { %p5008_p6 = por %p5007_p5, %p5006_p4 }
   0xc   :  { %p5009_p7 = pnand %p5008_p6, %p5002_p3 }
   0xe   :  { %5012 = shalt.err (!%p5009_p7)
}
   0xf   :  { %s5016_s28 = smov 256   ;;  %s5017_s29 = smov 16  }
  0x10   :  { %24 = dma.hbm_to_vmem [thread:$0]  %s6864_s1, 9216, %s19_s19, [#allocation3], %s5016_s28, %s5016_s28, %s5017_s29  }
  0x11   :  { %5013 = dma.done.wait [#allocation3], 9216  }
  0x12   :  { %5014 = vsyncadd [#allocation3], 4294958080  ;;  %v148_v0 = vlaneseq  ;;  %v5018_v1 = vmov 1983009808   ;;  %v123_v3 = vld [vmem:[%s6865_s2 + $0x80] sm:$0xff]  ;;  %v124_v4 = vld [vmem:[%s6865_s2 + $0x88] sm:$0xff] }
  0x13   :  { %v146_v2 = vunpack.c.l.s4 %v5018_v1  ;;  %v107_v5 = vld [vmem:[%s6865_s2] sm:$0xff]  ;;  %v214_v7 = vand.u32 4294901760, %v123_v3  ;;  %v217_v8 = vand.u32 4294901760, %v124_v4  ;;  %v108_v9 = vld [vmem:[%s6865_s2 + $0x8] sm:$0xff]  ;;  %v125_v11 = vld [vmem:[%s6865_s2 + $0x90] sm:$0xff]  ;;  %vm162_vm0 = vcmask 261120  }
  0x14   :  { %v5073_v6 = vshrl.u32 %v148_v0, 7  ;;  %v166_v10 = vand.u32 4294901760, %v107_v5  ;;  %v126_v12 = vld [vmem:[%s6865_s2 + $0x98] sm:$0xff]  ;;  %v169_v14 = vand.u32 4294901760, %v108_v9  ;;  %v220_v15 = vand.u32 4294901760, %v125_v11  ;;  %v109_v17 = vld [vmem:[%s6865_s2 + $0x10] sm:$0xff] }
  0x15   :  { %v147_v13 = vunpack.c.0.s8 %v146_v2  ;;  %v223_v16 = vand.u32 4294901760, %v126_v12  ;;  %v110_v18 = vld [vmem:[%s6865_s2 + $0x18] sm:$0xff]  ;;  %v127_v19 = vld [vmem:[%s6865_s2 + $0xa0] sm:$0xff]  ;;  %v5093_v20 = vpack.c.bf16 %v217_v8, %v214_v7  ;;  %v128_v21 = vld [vmem:[%s6865_s2 + $0xa8] sm:$0xff]  ;;  %v172_v27 = vand.u32 4294901760, %v109_v17 }
  0x16   :  { %7122 = vst [vmem:[#allocation5_spill] sm:$0xff] %v5073_v6  ;;  %v111_v22 = vld [vmem:[%s6865_s2 + $0x20] sm:$0xff]  ;;  %v112_v23 = vld [vmem:[%s6865_s2 + $0x28] sm:$0xff]  ;;  %v5104_v24 = vpack.c.bf16 %v169_v14, %v166_v10  ;;  %v129_v26 = vld [vmem:[%s6865_s2 + $0xb0] sm:$0xff]  ;;  %v175_v28 = vand.u32 4294901760, %v110_v18  ;;  %v226_v29 = vand.u32 4294901760, %v127_v19  ;;  %v5116_v31 = vsub.f32 %v123_v3, %v214_v7 }
  0x17   :  { %v5106_v25 = vpack.c.bf16 %v223_v16, %v220_v15  ;;  %4232 = vmatprep.subr.bf16.mxu0 %v5093_v20  ;;  %v5113_v30 = vsub.s32 %v147_v13, %v5073_v6  ;;  %4328 = vmatprep.subr.bf16.mxu1 %v5093_v20  ;;  %v229_v32 = vand.u32 4294901760, %v128_v21  ;;  %v178_v33 = vand.u32 4294901760, %v111_v22  ;;  %v130_v35 = vld [vmem:[%s6865_s2 + $0xb8] sm:$0xff]  ;;  %v113_v36 = vld [vmem:[%s6865_s2 + $0x30] sm:$0xff]  ;;  %v131_v46 = vld [vmem:[%s6865_s2 + $0xc0] sm:$0xff] }
  0x18   :  { %4234 = vmatpush3.bf16.msra.mxu0 %v5104_v24  ;;  %v181_v34 = vand.u32 4294901760, %v112_v23  ;;  %4330 = vmatpush3.bf16.msra.mxu1 %v5104_v24  ;;  %v5126_v37 = vsub.f32 %v124_v4, %v217_v8  ;;  %v5128_v38 = vsub.f32 %v107_v5, %v166_v10  ;;  %v5131_v39 = vpack.c.bf16 %v175_v28, %v172_v27  ;;  %v114_v41 = vld [vmem:[%s6865_s2 + $0x38] sm:$0xff]  ;;  %v132_v47 = vld [vmem:[%s6865_s2 + $0xc8] sm:$0xff]  ;;  %v115_v52 = vld [vmem:[%s6865_s2 + $0x40] sm:$0xff] }
  0x19   :  { %7123 = vst [vmem:[#allocation6_spill] sm:$0xff] %v5113_v30  ;;  %4236 = vmatprep.subr.bf16.mxu0 %v5106_v25  ;;  %v232_v40 = vand.u32 4294901760, %v129_v26  ;;  %v5136_v42 = vsub.f32 %v108_v9, %v169_v14  ;;  %v5138_v43 = vsub.f32 %v125_v11, %v220_v15  ;;  %v5140_v44 = vsub.f32 %v126_v12, %v223_v16  ;;  %v116_v53 = vld [vmem:[%s6865_s2 + $0x48] sm:$0xff]  ;;  %v133_v58 = vld [vmem:[%s6865_s2 + $0xd0] sm:$0xff]  ;;  %v134_v63 = vld [vmem:[%s6865_s2 + $0xd8] sm:$0xff] }
  0x1a   :  { %7124 = vst [vmem:[#allocation7_spill] sm:$0xff] %v5128_v38  ;;  %v5142_v45 = vpack.c.bf16 %v229_v32, %v226_v29  ;;  %4332 = vmatprep.subr.bf16.mxu1 %v5106_v25  ;;  %v5151_v48 = vsub.f32 %v109_v17, %v172_v27  ;;  %v5153_v49 = vsub.f32 %v110_v18, %v175_v28  ;;  %v235_v50 = vand.u32 4294901760, %v130_v35  ;;  %v117_v0 = vld [vmem:[%s6865_s2 + $0x50] sm:$0xff]  ;;  %v118_v1 = vld [vmem:[%s6865_s2 + $0x58] sm:$0xff]  ;;  %v135_v7 = vld [vmem:[%s6865_s2 + $0xe0] sm:$0xff] }
  0x1b   :  { %7125 = vst [vmem:[#allocation8_spill] sm:$0xff] %v5136_v42  ;;  %7126 = vst [vmem:[#allocation9_spill] sm:$0xff] %v5138_v43  ;;  %v184_v51 = vand.u32 4294901760, %v113_v36  ;;  %v5162_v54 = vsub.f32 %v127_v19, %v226_v29  ;;  %v5164_v55 = vsub.f32 %v128_v21, %v229_v32  ;;  %v5166_v56 = vpack.c.bf16 %v181_v34, %v178_v33  ;;  %v136_v8 = vld [vmem:[%s6865_s2 + $0xe8] sm:$0xff]  ;;  %v119_v17 = vld [vmem:[%s6865_s2 + $0x60] sm:$0xff] }
  0x1c   :  { %7127 = vst [vmem:[#allocation10_spill] sm:$0xff] %v5140_v44  ;;  %4238 = vmatpush3.bf16.msra.mxu0 %v5131_v39  ;;  %v187_v57 = vand.u32 4294901760, %v114_v41  ;;  %4334 = vmatpush3.bf16.msra.mxu1 %v5131_v39  ;;  %v5173_v59 = vsub.f32 %v111_v22, %v178_v33  ;;  %v5175_v60 = vpack.c.bf16 %v235_v50, %v232_v40  ;;  %v238_v61 = vand.u32 4294901760, %v131_v46  ;;  %v120_v18 = vld [vmem:[%s6865_s2 + $0x68] sm:$0xff]  ;;  %v5230_v32 = vld [vmem:[%s6865_s2 + $0xf0] sm:$0xff]  ;;  %v5235_v33 = vld [vmem:[%s6865_s2 + $0xf8] sm:$0xff] }
  0x1d   :  { %4240 = vmatprep.subr.bf16.mxu0 %v5142_v45  ;;  %v241_v62 = vand.u32 4294901760, %v132_v47  ;;  %4336 = vmatprep.subr.bf16.mxu1 %v5142_v45  ;;  %v5187_v2 = vsub.f32 %v112_v23, %v181_v34  ;;  %v5189_v3 = vsub.f32 %v129_v26, %v232_v40  ;;  %v190_v4 = vand.u32 4294901760, %v115_v52 }
  0x1e   :  { %v193_v5 = vand.u32 4294901760, %v116_v53  ;;  %v5197_v9 = vsub.f32 %v130_v35, %v235_v50  ;;  %v5199_v10 = vpack.c.bf16 %v187_v57, %v184_v51  ;;  %v5201_v11 = vsub.f32 %v113_v36, %v184_v51 }
  0x1f   :  { %7128 = vst [vmem:[#allocation11_spill] sm:$0xff] %v5189_v3  ;;  %v5203_v12 = vsub.f32 %v114_v41, %v187_v57  ;;  %v244_v13 = vand.u32 4294901760, %v133_v58  ;;  %v247_v14 = vand.u32 4294901760, %v134_v63  ;;  %v196_v15 = vand.u32 4294901760, %v117_v0  ;;  %v5244_v41 = vld [vmem:[%s6863_s0] sm:$0x3f] }
  0x20   :  { %4242 = vmatpush3.bf16.msra.mxu0 %v5166_v56  ;;  %v199_v16 = vand.u32 4294901760, %v118_v1  ;;  %4338 = vmatpush3.bf16.msra.mxu1 %v5166_v56  ;;  %v5214_v19 = vpack.c.bf16 %v241_v62, %v238_v61  ;;  %v5216_v21 = vsub.f32 %v131_v46, %v238_v61  ;;  %v250_v22 = vand.u32 4294901760, %v135_v7 }
  0x21   :  { %4244 = vmatprep.subr.bf16.mxu0 %v5175_v60  ;;  %v253_v23 = vand.u32 4294901760, %v136_v8  ;;  %4340 = vmatprep.subr.bf16.mxu1 %v5175_v60  ;;  %v5219_v26 = vsub.f32 %v132_v47, %v241_v62  ;;  %v5221_v27 = vpack.c.bf16 %v193_v5, %v190_v4  ;;  %v5223_v28 = vsub.f32 %v115_v52, %v190_v4  ;;  %v5258_v52 = vld [vmem:[%s6865_s2 + $0x70] sm:$0xff]  ;;  %v5270_v62 = vld [vmem:[%s6865_s2 + $0x78] sm:$0xff] }
  0x22   :  { %v5225_v29 = vsub.f32 %v116_v53, %v193_v5  ;;  %v5237_v34 = vpack.c.bf16 %v247_v14, %v244_v13  ;;  %v5239_v35 = vsub.f32 %v133_v58, %v244_v13  ;;  %v202_v36 = vand.u32 4294901760, %v119_v17 }
  0x23   :  { %v205_v40 = vand.u32 4294901760, %v120_v18  ;;  %v5247_v46 = vsub.f32 %v134_v63, %v247_v14  ;;  %v5249_v47 = vpack.c.bf16 %v199_v16, %v196_v15  ;;  %v5251_v50 = vsub.f32 %v117_v0, %v196_v15 }
  0x24   :  { %7129 = vst [vmem:[#allocation12_spill] sm:$0xff] %v5237_v34  ;;  %4246 = vmatpush3.bf16.msra.mxu0 %v5199_v10  ;;  %v5253_v51 = vsub.f32 %v118_v1, %v199_v16  ;;  %v5261_v53 = vpack.c.bf16 %v253_v23, %v250_v22  ;;  %v5263_v57 = vsub.f32 %v135_v7, %v250_v22  ;;  %v6870_v58 = vand.u32 4294901760, %v5230_v32 }
  0x25   :  { %7130 = vst [vmem:[#allocation13_spill] sm:$0xff] %v5249_v47  ;;  %4248 = vmatprep.subr.bf16.mxu0 %v5214_v19  ;;  %v6869_v61 = vand.u32 4294901760, %v5235_v33  ;;  %4342 = vmatpush3.bf16.msra.mxu1 %v5199_v10  ;;  %v5273_v63 = vsub.f32 %v136_v8, %v253_v23  ;;  %v151_v0 = vrot.slane %v5244_v41, %v5113_v30  ;;  %v6871_v1 = vand.u32 4294901760, %v5116_v31 }
  0x26   :  { %7131 = vst [vmem:[#allocation14_spill] sm:$0xff] %v5261_v53  ;;  %v6872_v4 = vand.u32 4294901760, %v5126_v37  ;;  %4344 = vmatprep.subr.bf16.mxu1 %v5214_v19  ;;  %v5280_v5 = vpack.c.bf16 %v205_v40, %v202_v36  ;;  %v5282_v7 = vsub.f32 %v119_v17, %v202_v36  ;;  %v5284_v13 = vsub.f32 %v120_v18, %v205_v40 }
  0x27   :  { %v5292_v8 = vpack.c.bf16 %v6869_v61, %v6870_v58  ;;  %v159_v16 = vcombine.high %v151_v0, %v151_v0  ;;  %v5295_v22 = vand.u32 4294901760, %v151_v0  ;;  %v393_v17 = vsub.f32 %v5116_v31, %v6871_v1 }
  0x28   :  { %7132 = vst [vmem:[#allocation15_spill] sm:$0xff] %v5280_v5  ;;  %4250 = vmatpush3.bf16.msra.mxu0 %v5221_v27  ;;  %v400_v18 = vsub.f32 %v5126_v37, %v6872_v4  ;;  %v6875_v23 = vand.u32 4294901760, %v5128_v38  ;;  %v6876_v36 = vand.u32 4294901760, %v5136_v42  ;;  %v7139_v15 = vand.u32 4294901760, %v5138_v43 }
  0x29   :  { %7133 = vst [vmem:[#allocation16_spill] sm:$0xff] %v5292_v8  ;;  %7134 = vst [vmem:[#allocation17_spill] sm:$0xff] %v5295_v22  ;;  %4252 = vmatprep.subr.bf16.mxu0 %v5237_v34  ;;  %4346 = vmatpush3.bf16.msra.mxu1 %v5221_v27  ;;  %v5307_v40 = vand.u32 4294901760, %v159_v16  ;;  %v5310_v61 = vsub.f32 %v151_v0, %v5295_v22  ;;  %v394_v1 = vand.u32 4294901760, %v393_v17  ;;  %v7142_v22 = vand.u32 4294901760, %v5270_v62 }
  0x2a   :  { %4348 = vmatprep.subr.bf16.mxu1 %v5237_v34  ;;  %v401_v14 = vand.u32 4294901760, %v400_v18  ;;  %v281_v4 = vsub.f32 %v5128_v38, %v6875_v23  ;;  %v288_v6 = vsub.f32 %v5136_v42, %v6876_v36  ;;  %v407_v17 = vsub.f32 %v5138_v43, %v7139_v15 }
  0x2b   :  { %7135 = vst [vmem:[#allocation18_spill] sm:$0xff] %v5307_v40  ;;  %7136 = vst [vmem:[#allocation19_spill] sm:$0xff] %v5310_v61  ;;  %v5323_v0 = vsub.f32 %v159_v16, %v5307_v40  ;;  %v5326_v58 = vand.u32 4294901760, %v5310_v61  ;;  %v7140_v18 = vand.u32 4294901760, %v5140_v44  ;;  %v7141_v36 = vand.u32 4294901760, %v5258_v52 }
  0x2c   :  { %4254 = vmatpush3.bf16.msra.mxu0 %v5249_v47  ;;  %v282_v16 = vand.u32 4294901760, %v281_v4  ;;  %v289_v34 = vand.u32 4294901760, %v288_v6  ;;  %v6890_v42 = vand.u32 4294901760, %v5151_v48  ;;  %v408_v43 = vand.u32 4294901760, %v407_v17 }
  0x2d   :  { %7137 = vst [vmem:[#allocation20_spill] sm:$0xff] %v5323_v0  ;;  %7138 = vst [vmem:[#allocation21_spill] sm:$0xff] %v5326_v58  ;;  %v414_v23 = vsub.f32 %v5140_v44, %v7140_v18  ;;  %4256 = vmatprep.subr.bf16.mxu0 %v5261_v53  ;;  %v5339_v30 = vpack.c.bf16 %v7142_v22, %v7141_v36  ;;  %4350 = vmatpush3.bf16.msra.mxu1 %v5249_v47  ;;  %v5344_v15 = vand.u32 4294901760, %v5323_v0  ;;  %vm5020_vm1 = vmmov 0  }
  0x2e   :  { %v270_v18 = vsub.f32 %v5310_v61, %v5326_v58  ;;  %v4263_v44 = vpack.c.bf16 %v401_v14, %v394_v1  ;;  %4352 = vmatprep.subr.bf16.mxu1 %v5261_v53  ;;  %v295_v4 = vsub.f32 %v5151_v48, %v6890_v42  ;;  %v6893_v6 = vand.u32 4294901760, %v5153_v49 }
  0x2f   :  { %7143 = vst [vmem:[#allocation22_spill] sm:$0xff] %v5344_v15  ;;  %v415_v38 = vand.u32 4294901760, %v414_v23  ;;  %v6895_v22 = vand.u32 4294901760, %v5162_v54  ;;  %v264_v36 = vsub.f32 %v5323_v0, %v5344_v15  ;;  %v4265_v1 = vpack.c.bf16 %v289_v34, %v282_v16  ;;  %746 = vmatprep.mubr.f32.mxu1 %v5344_v15 }
  0x30   :  { %4258 = vmatpush3.bf16.msra.mxu0 %v5280_v5  ;;  %v5357_v47 = vand.u32 4294901760, %v270_v18  ;;  %v6898_v14 = vand.u32 4294901760, %v5164_v55  ;;  %v296_v23 = vand.u32 4294901760, %v295_v4  ;;  %v302_v17 = vsub.f32 %v5153_v49, %v6893_v6 }
  0x31   :  { %4260 = vmatprep.subr.bf16.mxu0 %v5292_v8  ;;  %v421_v42 = vsub.f32 %v5162_v54, %v6895_v22  ;;  %v6900_v61 = vand.u32 4294901760, %v5173_v59  ;;  %4354 = vmatpush3.bf16.msra.mxu1 %v5280_v5  ;;  %v5370_v34 = vand.u32 4294901760, %v264_v36  ;;  %v6903_v18 = vand.u32 4294901760, %v5187_v2 }
  0x32   :  { %7144 = vst [vmem:[#allocation23_spill] sm:$0xff] %v5357_v47  ;;  %v428_v16 = vsub.f32 %v5164_v55, %v6898_v14  ;;  %v6905_v4 = vand.u32 4294901760, %v5189_v3  ;;  %4356 = vmatprep.subr.bf16.mxu1 %v5292_v8  ;;  %v303_v6 = vand.u32 4294901760, %v302_v17  ;;  %v7146_v8 = vand.u32 4294901760, %v5230_v32 }
  0x33   :  { %7145 = vst [vmem:[#allocation24_spill] sm:$0xff] %v5370_v34  ;;  %v422_v15 = vand.u32 4294901760, %v421_v42  ;;  %v309_v22 = vsub.f32 %v5173_v59, %v6900_v61  ;;  %266 = vmatprep.mubr.f32.mxu0 %v5370_v34  ;;  %v316_v14 = vsub.f32 %v5187_v2, %v6903_v18  ;;  %v6919_v42 = vand.u32 4294901760, %v5201_v11 }
  0x34   :  { %4262 = vmatpush3.bf16.msra.mxu0 %v5339_v30  ;;  %v429_v36 = vand.u32 4294901760, %v428_v16  ;;  %v435_v17 = vsub.f32 %v5189_v3, %v6905_v4  ;;  %v5394_v61 = vsub.f32 %v5230_v32, %v7146_v8  ;;  %v4267_v0 = vpack.c.bf16 %v415_v38, %v408_v43 }
  0x35   :  { %4264 = vmatprep.subr.bf16.mxu0 %v4263_v44  ;;  %v7147_v34 = vand.u32 4294901760, %v5197_v9  ;;  %v6912_v5 = vand.u32 4294901760, %v5203_v12  ;;  %4358 = vmatpush3.bf16.msra.mxu1 %v5339_v30  ;;  %v4269_v18 = vpack.c.bf16 %v303_v6, %v296_v23  ;;  %v310_v4 = vand.u32 4294901760, %v309_v22 }
  0x36   :  { %v4271_v53 = vpack.c.bf16 %v429_v36, %v422_v15  ;;  %v323_v3 = vsub.f32 %v5201_v11, %v6919_v42  ;;  %4392 = vmatprep.subr.bf16.mxu1 %v5093_v20  ;;  %v317_v38 = vand.u32 4294901760, %v316_v14  ;;  %v6911_v44 = vand.u32 4294901760, %v5216_v21 }
  0x37   :  { %v442_v16 = vsub.f32 %v5197_v9, %v7147_v34  ;;  %272 = vmatmul.mubr.f32.vlgmr.msra.gmra.mrb[0].mxu0 %v5357_v47  ;;  %v330_v43 = vsub.f32 %v5203_v12, %v6912_v5  ;;  %v6908_v32 = vand.u32 4294901760, %v5219_v26  ;;  %v436_v8 = vand.u32 4294901760, %v435_v17 }
  0x38   :  { %4266 = vmatpush3.bf16.msra.mxu0 %v4265_v1  ;;  %v6909_v6 = vand.u32 4294901760, %v5223_v28  ;;  %v6910_v22 = vand.u32 4294901760, %v5225_v29  ;;  %502 = vmatprep.mubr.f32.mxu0 %v5307_v40  ;;  %v324_v20 = vand.u32 4294901760, %v323_v3  ;;  %v449_v23 = vsub.f32 %v5216_v21, %v6911_v44 }
  0x39   :  { %v443_v15 = vand.u32 4294901760, %v442_v16  ;;  %4268 = vmatprep.subr.bf16.mxu0 %v4267_v0  ;;  %v331_v14 = vand.u32 4294901760, %v330_v43  ;;  %v456_v34 = vsub.f32 %v5219_v26, %v6908_v32  ;;  %750 = vmatmul.mubr.f32.vlgmr.msra.gmra.mrb[0].mxu1 %v5326_v58  ;;  %v6913_v3 = vand.u32 4294901760, %v5239_v35 }
  0x3a   :  { %v337_v1 = vsub.f32 %v5223_v28, %v6909_v6  ;;  %v344_v0 = vsub.f32 %v5225_v29, %v6910_v22  ;;  %v6914_v36 = vand.u32 4294901760, %v5247_v46  ;;  %4394 = vmatpush3.bf16.msra.mxu1 %v5104_v24  ;;  %1020 = vmatprep.mubr.f32.mxu1 %v5307_v40  ;;  %v7148_v17 = vand.u32 4294901760, %v5235_v33 }
  0x3b   :  { %v450_v43 = vand.u32 4294901760, %v449_v23  ;;  %v457_v32 = vand.u32 4294901760, %v456_v34  ;;  %v6918_v6 = vand.u32 4294901760, %v5251_v50  ;;  %4396 = vmatprep.subr.bf16.mxu1 %v5106_v25  ;;  %v7150_v22 = vand.u32 4294901760, %v5258_v52 }
  0x3c   :  { %v5434_v16 = vsub.f32 %v5235_v33, %v7148_v17  ;;  %4270 = vmatpush3.bf16.msra.mxu0 %v4269_v18  ;;  %v4273_v24 = vpack.c.bf16 %v317_v38, %v310_v4  ;;  %v463_v5 = vsub.f32 %v5239_v35, %v6913_v3  ;;  %v470_v33 = vsub.f32 %v5247_v46, %v6914_v36 }
  0x3d   :  { %v5441_v44 = vsub.f32 %v5258_v52, %v7150_v22  ;;  %v7151_v23 = vand.u32 4294901760, %v5270_v62  ;;  %4272 = vmatprep.subr.bf16.mxu0 %v4271_v53  ;;  %v4275_v25 = vpack.c.bf16 %v443_v15, %v436_v8  ;;  %v6917_v52 = vand.u32 4294901760, %v5253_v51 }
  0x3e   :  { %7149 = vst [vmem:[#allocation25_spill] sm:$0xff] %v5434_v16  ;;  %v6916_v18 = vand.u32 4294901760, %v5263_v57  ;;  %v4277_v4 = vpack.c.bf16 %v331_v14, %v324_v20  ;;  %v338_v38 = vand.u32 4294901760, %v337_v1  ;;  %v345_v22 = vand.u32 4294901760, %v344_v0  ;;  %4398 = vmatpush3.bf16.msra.mxu1 %v5131_v39 }
  0x3f   :  { %v5452_v34 = vsub.f32 %v5270_v62, %v7151_v23  ;;  %v6915_v17 = vand.u32 4294901760, %v5273_v63  ;;  %v4279_v3 = vpack.c.bf16 %v457_v32, %v450_v43  ;;  %v464_v36 = vand.u32 4294901760, %v463_v5  ;;  %4400 = vmatprep.subr.bf16.mxu1 %v5142_v45 }
  0x40   :  { %v351_v62 = vsub.f32 %v5251_v50, %v6918_v6  ;;  %v364_v53 = vand.u32 4294901760, %v5282_v7  ;;  %4274 = vmatpush3.bf16.msra.mxu0 %v4273_v24  ;;  %v471_v8 = vand.u32 4294901760, %v470_v33  ;;  %v358_v15 = vsub.f32 %v5253_v51, %v6917_v52 }
  0x41   :  { %v371_v20 = vand.u32 4294901760, %v5284_v13  ;;  %v490_v39 = vand.u32 4294901760, %v5394_v61  ;;  %4276 = vmatprep.subr.bf16.mxu0 %v4275_v25  ;;  %v477_v5 = vsub.f32 %v5263_v57, %v6916_v18  ;;  %v484_v32 = vsub.f32 %v5273_v63, %v6915_v17 }
  0x42   :  { %v365_v45 = vsub.f32 %v5282_v7, %v364_v53  ;;  %v497_v14 = vand.u32 4294901760, %v5434_v16  ;;  %v378_v43 = vand.u32 4294901760, %v5441_v44  ;;  %4402 = vmatpush3.bf16.msra.mxu1 %v5166_v56  ;;  %v385_v33 = vand.u32 4294901760, %v5452_v34 }
  0x43   :  { %v372_v1 = vsub.f32 %v5284_v13, %v371_v20  ;;  %v491_v0 = vsub.f32 %v5394_v61, %v490_v39  ;;  %4404 = vmatprep.subr.bf16.mxu1 %v5175_v60  ;;  %v4281_v23 = vpack.c.bf16 %v345_v22, %v338_v38  ;;  %v4283_v25 = vpack.c.bf16 %v471_v8, %v464_v36 }
  0x44   :  { %v498_v24 = vsub.f32 %v5434_v16, %v497_v14  ;;  %4278 = vmatpush3.bf16.msra.mxu0 %v4277_v4  ;;  %v352_v17 = vand.u32 4294901760, %v351_v62  ;;  %v359_v18 = vand.u32 4294901760, %v358_v15  ;;  %v478_v52 = vand.u32 4294901760, %v477_v5 }
  0x45   :  { %4280 = vmatprep.subr.bf16.mxu0 %v4279_v3  ;;  %v485_v6 = vand.u32 4294901760, %v484_v32  ;;  %v366_v42 = vand.u32 4294901760, %v365_v45  ;;  %v373_v58 = vand.u32 4294901760, %v372_v1  ;;  %v492_v47 = vand.u32 4294901760, %v491_v0  ;;  %v7166_v0 = vld [vmem:[#allocation12_spill] sm:$0xff] }
  0x46   :  { %v499_v40 = vand.u32 4294901760, %v498_v24  ;;  %v379_v56 = vsub.f32 %v5441_v44, %v378_v43  ;;  %v386_v16 = vsub.f32 %v5452_v34, %v385_v33  ;;  %4406 = vmatpush3.bf16.msra.mxu1 %v5199_v10  ;;  %v4285_v60 = vpack.c.bf16 %v359_v18, %v352_v17  ;;  %v7154_v10 = vld [vmem:[#allocation7_spill] sm:$0xff]  ;;  %v7156_v18 = vld [vmem:[#allocation8_spill] sm:$0xff] }
  0x47   :  { %4408 = vmatprep.subr.bf16.mxu1 %v5214_v19  ;;  %v144_v36 = vcombine.high %v5244_v41, %v5244_v41  ;;  %v4287_v3 = vpack.c.bf16 %v485_v6, %v478_v52  ;;  %v4289_v4 = vpack.c.bf16 %v373_v58, %v366_v42  ;;  %v7152_v8 = vand.u32 4294901760, %v5116_v31  ;;  %v7158_v41 = vld [vmem:[#allocation9_spill] sm:$0xff]  ;;  %v7160_v58 = vld [vmem:[#allocation10_spill] sm:$0xff] }
  0x48   :  { %4282 = vmatpush3.bf16.msra.mxu0 %v4281_v23  ;;  %v4291_v38 = vpack.c.bf16 %v499_v40, %v492_v47  ;;  %v380_v22 = vand.u32 4294901760, %v379_v56  ;;  %v387_v62 = vand.u32 4294901760, %v386_v16  ;;  %v7153_v15 = vand.u32 4294901760, %v5126_v37  ;;  %v7169_v56 = vld [vmem:[#allocation11_spill] sm:$0xff] }
  0x49   :  { %4284 = vmatprep.subr.bf16.mxu0 %v4283_v25  ;;  %v7155_v19 = vand.u32 4294901760, %v7154_v10  ;;  %v7157_v17 = vand.u32 4294901760, %v7156_v18  ;;  %v7159_v6 = vand.u32 4294901760, %v7158_v41  ;;  %v7161_v47 = vand.u32 4294901760, %v7160_v58 }
  0x4a   :  { %v5493_v5 = vpack.c.bf16 %v7153_v15, %v7152_v8  ;;  %4410 = vmatpush3.bf16.msra.mxu1 %v5221_v27  ;;  %v7162_v42 = vand.u32 4294901760, %v5151_v48  ;;  %v7163_v16 = vand.u32 4294901760, %v5153_v49  ;;  %v7164_v27 = vand.u32 4294901760, %v5162_v54 }
  0x4b   :  { %v5500_v32 = vpack.c.bf16 %v7157_v17, %v7155_v19  ;;  %v5506_v40 = vpack.c.bf16 %v7161_v47, %v7159_v6  ;;  %v7165_v45 = vand.u32 4294901760, %v5164_v55  ;;  %4412 = vmatprep.subr.bf16.mxu1 %v7166_v0  ;;  %v7167_v24 = vand.u32 4294901760, %v5173_v59 }
  0x4c   :  { %v5512_v52 = vpack.c.bf16 %v7163_v16, %v7162_v42  ;;  %4286 = vmatpush3.bf16.msra.mxu0 %v4285_v60  ;;  %v7168_v23 = vand.u32 4294901760, %v5187_v2  ;;  %v7170_v8 = vand.u32 4294901760, %v7169_v56  ;;  %v7171_v15 = vand.u32 4294901760, %v5197_v9 }
  0x4d   :  { %v5518_v1 = vpack.c.bf16 %v7165_v45, %v7164_v27  ;;  %v7172_v17 = vand.u32 4294901760, %v5201_v11  ;;  %v7173_v6 = vand.u32 4294901760, %v5203_v12  ;;  %v7174_v60 = vand.u32 4294901760, %v5216_v21  ;;  %4288 = vmatprep.subr.bf16.mxu0 %v4287_v3 }
  0x4e   :  { %v5525_v25 = vpack.c.bf16 %v7168_v23, %v7167_v24  ;;  %v5531_v19 = vpack.c.bf16 %v7171_v15, %v7170_v8  ;;  %v7175_v42 = vand.u32 4294901760, %v5219_v26  ;;  %v7176_v27 = vand.u32 4294901760, %v5223_v28 }
  0x4f   :  { %v5537_v47 = vpack.c.bf16 %v7173_v6, %v7172_v17  ;;  %v7177_v45 = vand.u32 4294901760, %v5225_v29  ;;  %v7179_v24 = vand.u32 4294901760, %v5239_v35  ;;  %v7180_v23 = vand.u32 4294901760, %v5247_v46 }
  0x50   :  { %v5543_v16 = vpack.c.bf16 %v7175_v42, %v7174_v60  ;;  %v7181_v15 = vand.u32 4294901760, %v5251_v50  ;;  %v7182_v17 = vand.u32 4294901760, %v5253_v51  ;;  %v7184_v3 = vand.u32 4294901760, %v5263_v57  ;;  %4290 = vmatpush3.bf16.msra.mxu0 %v4289_v4 }
  0x51   :  { %v5549_v0 = vpack.c.bf16 %v7177_v45, %v7176_v27  ;;  %v5555_v8 = vpack.c.bf16 %v7180_v23, %v7179_v24  ;;  %v7185_v60 = vand.u32 4294901760, %v5273_v63  ;;  %v7186_v27 = vld [vmem:[#allocation13_spill] sm:$0xff]  ;;  %v5570_v45 = vpack.c.bf16 %v371_v20, %v364_v53  ;;  %v7187_v23 = vld [vmem:[#allocation14_spill] sm:$0xff]  ;;  %4292 = vmatprep.subr.bf16.mxu0 %v4291_v38  ;;  %v5583_v53 = vld [vmem:[%s6865_s2 + $0x100] sm:$0xff] }
  0x52   :  { %v5561_v6 = vpack.c.bf16 %v7182_v17, %v7181_v15  ;;  %4414 = vmatpush3.bf16.msra.mxu1 %v7186_v27  ;;  %v5574_v24 = vpack.c.bf16 %v385_v33, %v378_v43  ;;  %v4293_v15 = vpack.c.bf16 %v387_v62, %v380_v22  ;;  %v7188_v17 = vld [vmem:[#allocation6_spill] sm:$0xff]  ;;  %v5588_v20 = vld [vmem:[%s6865_s2 + $0x108] sm:$0xff]  ;;  %v7190_v43 = vld [vmem:[#allocation16_spill] sm:$0xff]  ;;  %v4299_v4 = vpack.c.bf16 %v7160_v58, %v7158_v41 }
  0x53   :  { %7178 = vst [vmem:[#allocation7_spill] sm:$0xff] %v5549_v0  ;;  %v5567_v42 = vpack.c.bf16 %v7185_v60, %v7184_v3  ;;  %v5572_v0 = vpack.c.bf16 %v497_v14, %v490_v39  ;;  %4416 = vmatprep.subr.bf16.mxu1 %v7187_v23  ;;  %v4295_v3 = vpack.c.bf16 %v5126_v37, %v5116_v31  ;;  %v7189_v39 = vld [vmem:[#allocation15_spill] sm:$0xff]  ;;  %v1028_v37 = vand.u32 4294901760, %v5583_v53  ;;  %v5604_v38 = vld [vmem:[%s6865_s2 + $0x110] sm:$0xff]  ;;  %v7195_v60 = vld [vmem:[#allocation20_spill] sm:$0xff] }
  0x54   :  { %7183 = vst [vmem:[#allocation8_spill] sm:$0xff] %v5561_v6  ;;  %v158_v6 = vrot.slane %v144_v36, %v7188_v17  ;;  %4294 = vmatpush3.bf16.msra.mxu0 %v4293_v15  ;;  %v4297_v31 = vpack.c.bf16 %v7156_v18, %v7154_v10  ;;  %v1031_v36 = vand.u32 4294901760, %v5588_v20  ;;  %v5609_v22 = vld [vmem:[%s6865_s2 + $0x118] sm:$0xff]  ;;  %v7193_v18 = vld [vmem:[#allocation17_spill] sm:$0xff]  ;;  %v5019_v41 = vmov 0.0|0.0  }
  0x55   :  { %4296 = vmatprep.subr.bf16.mxu0 %v4295_v3  ;;  %v1037_v27 = vand.u32 4294901760, %v5609_v22  ;;  %v4303_v23 = vpack.c.bf16 %v5164_v55, %v5162_v54  ;;  %v4307_v54 = vpack.c.bf16 %v5197_v9, %v7169_v56  ;;  %v4309_v3 = vpack.c.bf16 %v5203_v12, %v5201_v11 }
  0x56   :  { %4418 = vmatpush3.bf16.msra.mxu1 %v7189_v39  ;;  %v163_v14 = vsel %vm162_vm0, %v158_v6, 0  ;;  %v5619_v10 = vpack.c.bf16 %v1031_v36, %v1028_v37  ;;  %v4301_v6 = vpack.c.bf16 %v5153_v49, %v5151_v48  ;;  %v6925_v48 = vmov 0.0  }
  0x57   :  { %4420 = vmatprep.subr.bf16.mxu1 %v7190_v43  ;;  %v5593_v33 = vand.u32 4294901760, %v163_v14  ;;  %504 = vmatmul.mubr.f32.vlgmr.msra.gmra.mrb[2].mxu0 %v7193_v18  ;;  %v4305_v49 = vpack.c.bf16 %v5187_v2, %v5173_v59  ;;  %v4311_v39 = vpack.c.bf16 %v5219_v26, %v5216_v21  ;;  %v4313_v59 = vpack.c.bf16 %v5225_v29, %v5223_v28  ;;  %v7197_v21 = vld [vmem:[#allocation25_spill] sm:$0xff]  ;;  %v7198_v29 = vld [vmem:[#allocation19_spill] sm:$0xff] }
  0x58   :  { %4298 = vmatpush3.bf16.msra.mxu0 %v4297_v31  ;;  %639 = vmatprep.mubr.f32.mxu0 %v7195_v60  ;;  %v4315_v2 = vpack.c.bf16 %v5247_v46, %v5239_v35  ;;  %v4317_v9 = vpack.c.bf16 %v5253_v51, %v5251_v50  ;;  %v4319_v11 = vpack.c.bf16 %v5273_v63, %v5263_v57  ;;  %v7199_v35 = vld [vmem:[#allocation18_spill] sm:$0xff]  ;;  %v5724_v43 = vld [vmem:[#allocation2] sm:$0xff]  ;;  %v5726_v31 = vld [vmem:[#allocation2 + $0x10] sm:$0xff] }
  0x59   :  { %7191 = vst [vmem:[#allocation9_spill] sm:$0xff] %v5593_v33  ;;  %v5612_v62 = vsub.f32 %v163_v14, %v5593_v33  ;;  %4300 = vmatprep.subr.bf16.mxu0 %v4299_v4  ;;  %v4321_v12 = vpack.c.bf16 %v5284_v13, %v5282_v7  ;;  %v4323_v26 = vpack.c.bf16 %v7197_v21, %v5394_v61  ;;  %v2068_v4 = vand.u32 4294901760, %v5724_v43 }
  0x5a   :  { %4422 = vmatpush3.bf16.msra.mxu1 %v5339_v30  ;;  %v1034_v30 = vand.u32 4294901760, %v5604_v38  ;;  %v4325_v28 = vpack.c.bf16 %v5452_v34, %v5441_v44  ;;  %v1108_v46 = vsub.f32 %v5583_v53, %v1028_v37  ;;  %v1115_v50 = vsub.f32 %v5588_v20, %v1031_v36  ;;  %v7200_v51 = vld [vmem:[#allocation7_spill] sm:$0xff]  ;;  %v5719_v53 = vld [vmem:[#allocation2 + $0x18] sm:$0xff]  ;;  %v5728_v37 = vld [vmem:[#allocation2 + $0x28] sm:$0xff] }
  0x5b   :  { %7192 = vst [vmem:[#allocation10_spill] sm:$0xff] %v5612_v62  ;;  %4423 = vmatprep.subr.bf16.mxu1 %v5019_v41  ;;  %v5624_v58 = vand.u32 4294901760, %v5612_v62  ;;  %v1129_v7 = vsub.f32 %v5609_v22, %v1037_v27  ;;  %v7201_v13 = vld [vmem:[#allocation8_spill] sm:$0xff]  ;;  %v2070_v14 = vand.u32 4294901760, %v5719_v53 }
  0x5c   :  { %v5637_v17 = vpack.c.bf16 %v1037_v27, %v1034_v30  ;;  %4302 = vmatpush3.bf16.msra.mxu0 %v4301_v6  ;;  %v1109_v57 = vand.u32 4294901760, %v1108_v46  ;;  %v1116_v61 = vand.u32 4294901760, %v1115_v50  ;;  %v1122_v63 = vsub.f32 %v5604_v38, %v1034_v30  ;;  %v5730_v36 = vld [vmem:[#allocation2 + $0x38] sm:$0xff]  ;;  %v39_v27 = vld [vmem:[#allocation2 + $0x20] sm:$0xff] }
  0x5d   :  { %7194 = vst [vmem:[#allocation12_spill] sm:$0xff] %v5624_v58  ;;  %1022 = vmatmul.mubr.f32.vlgmr.msra.gmra.mrb[2].mxu1 %v7193_v18  ;;  %v1099_v15 = vsub.f32 %v5612_v62, %v5624_v58  ;;  %4304 = vmatprep.subr.bf16.mxu0 %v4303_v23  ;;  %v2072_v38 = vand.u32 4294901760, %v5726_v31  ;;  %v2074_v6 = vand.u32 4294901760, %v5728_v37  ;;  %v2078_v30 = vand.u32 4294901760, %v5730_v36  ;;  %v41_v23 = vld [vmem:[#allocation2 + $0x30] sm:$0xff] }
  0x5e   :  { %4425 = vmatpush3.bf16.msra.mxu1 %v5619_v10  ;;  %4173 = vmatprep.mubr.msk.f32.mxu1 %vm5020_vm1, %v6925_v48  ;;  %v1110_v44 = vsub.f32 %v1108_v46, %v1109_v57  ;;  %v1117_v34 = vsub.f32 %v1115_v50, %v1116_v61 }
  0x5f   :  { %4426 = vmatprep.subr.bf16.mxu1 %v5019_v41  ;;  %v5646_v55 = vand.u32 4294901760, %v1099_v15  ;;  %v46_v15 = vld [vmem:[#allocation2 + $0x58] sm:$0xff] }
  0x60   :  { %4306 = vmatpush3.bf16.msra.mxu0 %v4305_v49  ;;  %v5746_v49 = vpack.c.bf16 %v2072_v38, %v2068_v4 }
  0x61   :  { %7196 = vst [vmem:[#allocation11_spill] sm:$0xff] %v5646_v55  ;;  %4308 = vmatprep.subr.bf16.mxu0 %v4307_v54  ;;  %v2076_v54 = vand.u32 4294901760, %v39_v27 }
  0x62   :  { %4428 = vmatpush3.bf16.msra.mxu1 %v5637_v17  ;;  %7203 = vst [vmem:[#allocation14_spill] sm:$0xff] %v5746_v49 }
  0x64   :  { %4310 = vmatpush3.bf16.msra.mxu0 %v4309_v3  ;;  %v2080_v3 = vand.u32 4294901760, %v41_v23 }
  0x65   :  { %4174 = vmatmul.mubr.f32.vlgmr.msra.gmra.mrb[4].mxu1 %v5646_v55  ;;  %4312 = vmatprep.subr.bf16.mxu0 %v4311_v39  ;;  %v62_v55 = vld [vmem:[#allocation2 + $0xd8] sm:$0xff] }
  0x66   :  { %1595 = vmatprep.mubr.f32.mxu1 %v6925_v48  ;;  %v5753_v21 = vpack.c.bf16 %v2080_v3, %v2076_v54 }
  0x68   :  { %4314 = vmatpush3.bf16.msra.mxu0 %v4313_v59  ;;  %v2086_v59 = vand.u32 4294901760, %v46_v15  ;;  %7205 = vst [vmem:[#allocation15_spill] sm:$0xff] %v5753_v21 }
  0x69   :  { %4316 = vmatprep.subr.bf16.mxu0 %v4315_v2  ;;  %v43_v2 = vld [vmem:[#allocation2 + $0x40] sm:$0xff] }
  0x6c   :  { %4318 = vmatpush3.bf16.msra.mxu0 %v4317_v9  ;;  %v45_v9 = vld [vmem:[#allocation2 + $0x50] sm:$0xff] }
  0x6d   :  { %4320 = vmatprep.subr.bf16.mxu0 %v4319_v11  ;;  %v48_v11 = vld [vmem:[#allocation2 + $0x68] sm:$0xff] }
  0x70   :  { %4322 = vmatpush3.bf16.msra.mxu0 %v4321_v12  ;;  %v50_v12 = vld [vmem:[#allocation2 + $0x78] sm:$0xff] }
  0x71   :  { %4324 = vmatprep.subr.bf16.mxu0 %v4323_v26  ;;  %v2088_v26 = vand.u32 4294901760, %v45_v9 }
  0x74   :  { %4326 = vmatpush3.bf16.msra.mxu0 %v4325_v28  ;;  %v7206_v28 = vld [vmem:[#allocation24_spill] sm:$0xff] }
  0x75   :  { %4360 = vmatprep.subr.bf16.mxu0 %v5493_v5  ;;  %v1123_v5 = vand.u32 4294901760, %v1122_v63 }
  0x77   :  { %642 = vmatmul.mubr.f32.vlgmr.msra.gmra.mrb[4].mxu0 %v7198_v29 }
  0x78   :  { %4362 = vmatpush3.bf16.msra.mxu0 %v5500_v32  ;;  %916 = vmatprep.mubr.f32.mxu0 %v7199_v35  ;;  %v1130_v32 = vand.u32 4294901760, %v1129_v7  ;;  %v77_v35 = vld [vmem:[#allocation2 + $0x150] sm:$0xff] }
  0x79   :  { %4364 = vmatprep.subr.bf16.mxu0 %v5506_v40  ;;  %v1111_v40 = vand.u32 4294901760, %v1110_v44 }
  0x7c   :  { %4366 = vmatpush3.bf16.msra.mxu0 %v5512_v52  ;;  %v1118_v52 = vand.u32 4294901760, %v1117_v34 }
  0x7d   :  { %4368 = vmatprep.subr.bf16.mxu0 %v5518_v1  ;;  %v1124_v1 = vsub.f32 %v1122_v63, %v1123_v5 }
  0x7e   :  { %v4430_v56 = vpack.c.bf16 %v1118_v52, %v1111_v40  ;;  %v51_v52 = vld [vmem:[#allocation2 + $0x80] sm:$0xff] }
  0x80   :  { %4370 = vmatpush3.bf16.msra.mxu0 %v5525_v25  ;;  %v1131_v25 = vsub.f32 %v1129_v7, %v1130_v32 }
  0x81   :  { %4372 = vmatprep.subr.bf16.mxu0 %v5531_v19  ;;  %v1125_v19 = vand.u32 4294901760, %v1124_v1  ;;  %v53_v1 = vld [vmem:[#allocation2 + $0x90] sm:$0xff] }
  0x84   :  { %4374 = vmatpush3.bf16.msra.mxu0 %v5537_v47  ;;  %v1132_v47 = vand.u32 4294901760, %v1131_v25  ;;  %v56_v25 = vld [vmem:[#allocation2 + $0xa8] sm:$0xff] }
  0x85   :  { %4376 = vmatprep.subr.bf16.mxu0 %v5543_v16 }
  0x86   :  { %v4433_v16 = vpack.c.bf16 %v1132_v47, %v1125_v19  ;;  %v2100_v47 = vand.u32 4294901760, %v51_v52 }
  0x88   :  { %4378 = vmatpush3.bf16.msra.mxu0 %v7200_v51  ;;  %v2094_v51 = vand.u32 4294901760, %v50_v12 }
  0x89   :  { %4380 = vmatprep.subr.bf16.mxu0 %v5555_v8  ;;  %v4436_v8 = vpack.c.bf16 %v1115_v50, %v1108_v46  ;;  %v2090_v50 = vand.u32 4294901760, %v48_v11 }
  0x8c   :  { %4382 = vmatpush3.bf16.msra.mxu0 %v7201_v13 }
  0x8d   :  { %4384 = vmatprep.subr.bf16.mxu0 %v5567_v42  ;;  %v4448_v42 = vpack.c.bf16 %v1116_v61, %v1109_v57  ;;  %v47_v57 = vld [vmem:[#allocation2 + $0x60] sm:$0xff]  ;;  %v49_v61 = vld [vmem:[#allocation2 + $0x70] sm:$0xff] }
  0x8e   :  { %v2092_v44 = vand.u32 4294901760, %v47_v57  ;;  %v2096_v34 = vand.u32 4294901760, %v49_v61 }
  0x90   :  { %4386 = vmatpush3.bf16.msra.mxu0 %v5570_v45  ;;  %v4451_v45 = vpack.c.bf16 %v1130_v32, %v1123_v5  ;;  %v5763_v5 = vpack.c.bf16 %v2094_v51, %v2090_v50  ;;  %v5766_v19 = vpack.c.bf16 %v2096_v34, %v2092_v44 }
  0x91   :  { %4388 = vmatprep.subr.bf16.mxu0 %v5572_v0  ;;  %v4439_v0 = vpack.c.bf16 %v1129_v7, %v1122_v63  ;;  %v52_v63 = vld [vmem:[#allocation2 + $0x88] sm:$0xff]  ;;  %v54_v7 = vld [vmem:[#allocation2 + $0x98] sm:$0xff] }
  0x92   :  { %7209 = vst [vmem:[#allocation7_spill] sm:$0xff] %v5763_v5  ;;  %v2098_v32 = vand.u32 4294901760, %v52_v63  ;;  %v2102_v40 = vand.u32 4294901760, %v54_v7  ;;  %7210 = vst [vmem:[#allocation8_spill] sm:$0xff] %v5766_v19 }
  0x94   :  { %4390 = vmatpush3.bf16.msra.mxu0 %v5574_v24  ;;  %v5717_v24 = vld [vmem:[#allocation2 + $0x8] sm:$0xff] }
  0x95   :  { %4429 = vmatprep.subr.bf16.mxu0 %v5019_v41  ;;  %v2066_v20 = vand.u32 4294901760, %v5717_v24 }
  0x97   :  { %918 = vmatmul.mubr.f32.vlgmr.msra.gmra.mrb[6].mxu0 %v7193_v18  ;;  %v5741_v22 = vpack.c.bf16 %v2070_v14, %v2066_v20  ;;  %v75_v18 = vld [vmem:[#allocation2 + $0x140] sm:$0xff] }
  0x98   :  { %4431 = vmatpush3.bf16.msra.mxu0 %v4430_v56  ;;  %4184 = vmatprep.mubr.msk.f32.mxu0 %vm5020_vm1, %v6925_v48  ;;  %v58_v56 = vld [vmem:[#allocation2 + $0xb8] sm:$0xff] }
  0x99   :  { %4432 = vmatprep.subr.bf16.mxu0 %v5019_v41  ;;  %7202 = vst [vmem:[#allocation13_spill] sm:$0xff] %v5741_v22 }
  0x9c   :  { %4434 = vmatpush3.bf16.msra.mxu0 %v4433_v16  ;;  %v2104_v16 = vand.u32 4294901760, %v53_v1 }
  0x9d   :  { %4435 = vmatprep.subr.bf16.mxu0 %v5019_v41 }
  0x9f   :  { %4185 = vmatmul.mubr.f32.vlgmr.msra.gmra.mrb[8].mxu0 %v5593_v33 }
  0xa0   :  { %4437 = vmatpush3.bf16.msra.mxu0 %v4436_v8  ;;  %4195 = vmatprep.mubr.msk.f32.mxu0 %vm5020_vm1, %v6925_v48  ;;  %v5769_v8 = vsub.f32 %v5717_v24, %v2066_v20  ;;  %v5786_v24 = vsub.f32 %v5728_v37, %v2074_v6  ;;  %v60_v20 = vld [vmem:[#allocation2 + $0xc8] sm:$0xff] }
  0xa1   :  { %4438 = vmatprep.subr.bf16.mxu0 %v5019_v41 }
  0xa2   :  { %7211 = vst [vmem:[#allocation24_spill] sm:$0xff] %v5769_v8 }
  0xa4   :  { %4440 = vmatpush3.bf16.msra.mxu0 %v4439_v0  ;;  %v5772_v0 = vpack.c.bf16 %v2102_v40, %v2098_v32 }
  0xa5   :  { %4441 = vmatprep.subr.bf16.mxu0 %v5019_v41 }
  0xa6   :  { %7212 = vst [vmem:[#allocation26_spill] sm:$0xff] %v5772_v0 }
  0xa7   :  { %4196 = vmatmul.mubr.f32.vlgmr.msra.gmra.mrb[8].mxu0 %v5612_v62  ;;  %v5780_v62 = vsub.f32 %v5724_v43, %v2068_v4  ;;  %v5800_v43 = vpack.c.bf16 %v2104_v16, %v2100_v47  ;;  %v59_v4 = vld [vmem:[#allocation2 + $0xc0] sm:$0xff] }
  0xa8   :  { %4443 = vmatpush3.bf16.msra.mxu0 %v5619_v10  ;;  %4206 = vmatprep.mubr.msk.f32.mxu0 %vm5020_vm1, %v6925_v48 }
  0xa9   :  { %4444 = vmatprep.subr.bf16.mxu0 %v5019_v41  ;;  %7214 = vst [vmem:[#allocation28_spill] sm:$0xff] %v5780_v62  ;;  %7218 = vst [vmem:[#allocation32_spill] sm:$0xff] %v5800_v43 }
  0xac   :  { %4446 = vmatpush3.bf16.msra.mxu0 %v5637_v17 }
  0xad   :  { %4447 = vmatprep.subr.bf16.mxu0 %v5019_v41 }
  0xaf   :  { %4207 = vmatmul.mubr.f32.vlgmr.msra.gmra.mrb[8].mxu0 %v5624_v58  ;;  %v5777_v58 = vsub.f32 %v5719_v53, %v2070_v14  ;;  %v5797_v14 = vsub.f32 %v46_v15, %v2086_v59  ;;  %v5811_v15 = vsub.f32 %v50_v12, %v2094_v51 }
  0xb0   :  { %4449 = vmatpush3.bf16.msra.mxu0 %v4448_v42  ;;  %4217 = vmatprep.mubr.msk.f32.mxu0 %vm5020_vm1, %v6925_v48  ;;  %v2106_v42 = vand.u32 4294901760, %v56_v25 }
  0xb1   :  { %4450 = vmatprep.subr.bf16.mxu0 %v5019_v41  ;;  %7213 = vst [vmem:[#allocation27_spill] sm:$0xff] %v5777_v58  ;;  %7217 = vst [vmem:[#allocation31_spill] sm:$0xff] %v5797_v14 }
  0xb2   :  { %7223 = vst [vmem:[#allocation37_spill] sm:$0xff] %v5811_v15  ;;  %v5829_v51 = vsub.f32 %v56_v25, %v2106_v42 }
  0xb4   :  { %4452 = vmatpush3.bf16.msra.mxu0 %v4451_v45  ;;  %v2110_v45 = vand.u32 4294901760, %v58_v56  ;;  %7231 = vst [vmem:[#allocation45_spill] sm:$0xff] %v5829_v51 }
  0xb5   :  { %4453 = vmatprep.subr.bf16.mxu0 %v5019_v41 }
  0xb7   :  { %4218 = vmatmul.mubr.f32.vlgmr.msra.gmra.mrb[8].mxu0 %v5593_v33 }
  0xb8   :  { %4455 = vmatpush3.bf16.msra.mxu0 %v5619_v10  ;;  %4228 = vmatprep.mubr.msk.f32.mxu0 %vm5020_vm1, %v6925_v48  ;;  %v44_v10 = vld [vmem:[#allocation2 + $0x48] sm:$0xff]  ;;  %v57_v48 = vld [vmem:[#allocation2 + $0xb0] sm:$0xff] }
  0xb9   :  { %4456 = vmatprep.subr.bf16.mxu0 %v5019_v41  ;;  %v5749_v41 = vpack.c.bf16 %v2078_v30, %v2074_v6  ;;  %v2082_v39 = vand.u32 4294901760, %v44_v10  ;;  %v2112_v37 = vand.u32 4294901760, %v57_v48 }
  0xbb   :  { %7204 = vst [vmem:[#allocation6_spill] sm:$0xff] %v5749_v41  ;;  %v5757_v46 = vpack.c.bf16 %v2086_v59, %v2082_v39  ;;  %v5795_v53 = vsub.f32 %v44_v10, %v2082_v39  ;;  %v5809_v10 = vsub.f32 %v48_v11, %v2090_v50  ;;  %v66_v39 = vld [vmem:[#allocation2 + $0xf8] sm:$0xff]  ;;  %v5815_v59 = vsub.f32 %v49_v61, %v2096_v34  ;;  %v68_v50 = vld [vmem:[#allocation2 + $0x108] sm:$0xff]  ;;  %v69_v34 = vld [vmem:[#allocation2 + $0x110] sm:$0xff] }
  0xbc   :  { %4458 = vmatpush3.bf16.msra.mxu0 %v5637_v17  ;;  %v2084_v17 = vand.u32 4294901760, %v43_v2  ;;  %v5824_v11 = vsub.f32 %v53_v1, %v2104_v16 }
  0xbd   :  { %4508 = vmatprep.subr.bf16.mxu0 %v5741_v22  ;;  %7207 = vst [vmem:[#allocation16_spill] sm:$0xff] %v5757_v46  ;;  %7216 = vst [vmem:[#allocation30_spill] sm:$0xff] %v5795_v53 }
  0xbe   :  { %v5760_v13 = vpack.c.bf16 %v2088_v26, %v2084_v17  ;;  %v5802_v6 = vsub.f32 %v43_v2, %v2084_v17  ;;  %7222 = vst [vmem:[#allocation36_spill] sm:$0xff] %v5809_v10  ;;  %7225 = vst [vmem:[#allocation39_spill] sm:$0xff] %v5815_v59  ;;  %v5817_v2 = vsub.f32 %v52_v63, %v2098_v32  ;;  %v2116_v17 = vand.u32 4294901760, %v59_v4 }
  0xbf   :  { %4229 = vmatmul.mubr.f32.vlgmr.msra.gmra.mrb[8].mxu0 %v5593_v33  ;;  %v5783_v33 = vsub.f32 %v5726_v31, %v2072_v38  ;;  %v61_v38 = vld [vmem:[#allocation2 + $0xd0] sm:$0xff]  ;;  %7229 = vst [vmem:[#allocation43_spill] sm:$0xff] %v5824_v11  ;;  %v2126_v63 = vand.u32 4294901760, %v66_v39  ;;  %v5833_v32 = vsub.f32 %v58_v56, %v2110_v45  ;;  %v2130_v56 = vand.u32 4294901760, %v68_v50 }
  0xc0   :  { %4510 = vmatpush1.bf16.msra.mxu0 %v5746_v49  ;;  %2199 = vmatprep.mubr.f32.mxu0 %v7206_v28  ;;  %7208 = vst [vmem:[#allocation25_spill] sm:$0xff] %v5760_v13  ;;  %v55_v28 = vld [vmem:[#allocation2 + $0xa0] sm:$0xff]  ;;  %7219 = vst [vmem:[#allocation33_spill] sm:$0xff] %v5802_v6  ;;  %v73_v49 = vld [vmem:[#allocation2 + $0x130] sm:$0xff] }
  0xc1   :  { %4512 = vmatprep.subr.bf16.mxu0 %v5749_v41  ;;  %7215 = vst [vmem:[#allocation29_spill] sm:$0xff] %v5783_v33  ;;  %v2108_v31 = vand.u32 4294901760, %v55_v28  ;;  %7226 = vst [vmem:[#allocation40_spill] sm:$0xff] %v5817_v2  ;;  %v71_v41 = vld [vmem:[#allocation2 + $0x120] sm:$0xff]  ;;  %v2144_v60 = vand.u32 4294901760, %v73_v49 }
  0xc2   :  { %7233 = vst [vmem:[#allocation47_spill] sm:$0xff] %v5833_v32  ;;  %v2140_v29 = vand.u32 4294901760, %v71_v41 }
  0xc3   :  { %v5826_v12 = vpack.c.bf16 %v2112_v37, %v2108_v31 }
  0xc4   :  { %4514 = vmatpush1.bf16.msra.mxu0 %v5753_v21  ;;  %v5819_v21 = vsub.f32 %v54_v7, %v2102_v40  ;;  %v70_v7 = vld [vmem:[#allocation2 + $0x118] sm:$0xff]  ;;  %v5835_v40 = vsub.f32 %v55_v28, %v2108_v31  ;;  %v2136_v31 = vand.u32 4294901760, %v69_v34 }
  0xc5   :  { %4516 = vmatprep.subr.bf16.mxu0 %v5757_v46  ;;  %v5793_v46 = vsub.f32 %v41_v23, %v2080_v3  ;;  %v5807_v23 = vsub.f32 %v45_v9, %v2088_v26  ;;  %v64_v3 = vld [vmem:[#allocation2 + $0xe8] sm:$0xff]  ;;  %v5822_v9 = vsub.f32 %v51_v52, %v2100_v47  ;;  %7230 = vst [vmem:[#allocation44_spill] sm:$0xff] %v5826_v12  ;;  %v65_v26 = vld [vmem:[#allocation2 + $0xf0] sm:$0xff] }
  0xc6   :  { %7227 = vst [vmem:[#allocation41_spill] sm:$0xff] %v5819_v21  ;;  %v2122_v61 = vand.u32 4294901760, %v64_v3  ;;  %7234 = vst [vmem:[#allocation48_spill] sm:$0xff] %v5835_v40  ;;  %v5837_v52 = vsub.f32 %v57_v48, %v2112_v37  ;;  %v72_v47 = vld [vmem:[#allocation2 + $0x128] sm:$0xff]  ;;  %v5847_v48 = vsub.f32 %v59_v4, %v2116_v17 }
  0xc7   :  { %7221 = vst [vmem:[#allocation35_spill] sm:$0xff] %v5807_v23  ;;  %7228 = vst [vmem:[#allocation42_spill] sm:$0xff] %v5822_v9  ;;  %v2138_v37 = vand.u32 4294901760, %v72_v47 }
  0xc8   :  { %4518 = vmatpush1.bf16.msra.mxu0 %v5760_v13  ;;  %v5791_v13 = vsub.f32 %v39_v27, %v2076_v54  ;;  %v2118_v27 = vand.u32 4294901760, %v62_v55  ;;  %v5813_v54 = vsub.f32 %v47_v57, %v2092_v44  ;;  %v67_v44 = vld [vmem:[#allocation2 + $0x100] sm:$0xff]  ;;  %7235 = vst [vmem:[#allocation49_spill] sm:$0xff] %v5837_v52  ;;  %7239 = vst [vmem:[#allocation53_spill] sm:$0xff] %v5847_v48 }
  0xc9   :  { %4520 = vmatprep.subr.bf16.mxu0 %v5763_v5  ;;  %v5789_v5 = vsub.f32 %v5730_v36, %v2078_v30  ;;  %v5805_v36 = vpack.c.bf16 %v2110_v45, %v2106_v42  ;;  %v2114_v30 = vand.u32 4294901760, %v60_v20  ;;  %v2128_v42 = vand.u32 4294901760, %v65_v26 }
  0xca   :  { %7224 = vst [vmem:[#allocation38_spill] sm:$0xff] %v5813_v54  ;;  %v2134_v45 = vand.u32 4294901760, %v70_v7  ;;  %v2132_v28 = vand.u32 4294901760, %v67_v44 }
  0xcb   :  { %7220 = vst [vmem:[#allocation34_spill] sm:$0xff] %v5805_v36  ;;  %v5831_v57 = vpack.c.bf16 %v2118_v27, %v2114_v30  ;;  %v5839_v16 = vsub.f32 %v60_v20, %v2114_v30  ;;  %v76_v30 = vld [vmem:[#allocation2 + $0x148] sm:$0xff] }
  0xcc   :  { %4522 = vmatpush1.bf16.msra.mxu0 %v5766_v19  ;;  %v63_v19 = vld [vmem:[#allocation2 + $0xe0] sm:$0xff] }
  0xcd   :  { %4524 = vmatprep.subr.bf16.mxu0 %v5772_v0  ;;  %v2120_v0 = vand.u32 4294901760, %v61_v38  ;;  %7232 = vst [vmem:[#allocation46_spill] sm:$0xff] %v5831_v57  ;;  %v2124_v1 = vand.u32 4294901760, %v63_v19  ;;  %7236 = vst [vmem:[#allocation50_spill] sm:$0xff] %v5839_v16 }
  0xcf   :  { %v5843_v25 = vpack.c.bf16 %v2120_v0, %v2116_v17  ;;  %v5849_v20 = vsub.f32 %v61_v38, %v2120_v0  ;;  %v5857_v16 = vpack.c.bf16 %v2128_v42, %v2124_v1  ;;  %v5859_v4 = vsub.f32 %v63_v19, %v2124_v1 }
  0xd0   :  { %4526 = vmatpush1.bf16.msra.mxu0 %v5800_v43  ;;  %v74_v43 = vld [vmem:[#allocation2 + $0x138] sm:$0xff]  ;;  %v5861_v0 = vsub.f32 %v65_v26, %v2128_v42  ;;  %v5864_v38 = vpack.c.bf16 %v2134_v45, %v2130_v56  ;;  %v5868_v17 = vsub.f32 %v70_v7, %v2134_v45  ;;  %v2148_v19 = vand.u32 4294901760, %v75_v18  ;;  %v79_v26 = vld [vmem:[#allocation2 + $0x160] sm:$0xff]  ;;  %v81_v42 = vld [vmem:[#allocation2 + $0x170] sm:$0xff] }
  0xd1   :  { %4528 = vmatprep.subr.bf16.mxu0 %v5805_v36  ;;  %v5841_v36 = vsub.f32 %v62_v55, %v2118_v27  ;;  %7238 = vst [vmem:[#allocation52_spill] sm:$0xff] %v5843_v25  ;;  %7240 = vst [vmem:[#allocation54_spill] sm:$0xff] %v5849_v20  ;;  %v5851_v55 = vpack.c.bf16 %v2126_v63, %v2122_v61  ;;  %v5853_v27 = vsub.f32 %v64_v3, %v2122_v61 }
  0xd2   :  { %v2142_v22 = vand.u32 4294901760, %v74_v43  ;;  %7244 = vst [vmem:[#allocation58_spill] sm:$0xff] %v5857_v16  ;;  %7245 = vst [vmem:[#allocation59_spill] sm:$0xff] %v5859_v4  ;;  %v5866_v3 = vsub.f32 %v68_v50, %v2130_v56  ;;  %v5870_v61 = vpack.c.bf16 %v2136_v31, %v2132_v28  ;;  %v2152_v1 = vand.u32 4294901760, %v77_v35  ;;  %v86_v4 = vld [vmem:[#allocation2 + $0x198] sm:$0xff] }
  0xd3   :  { %7237 = vst [vmem:[#allocation51_spill] sm:$0xff] %v5841_v36  ;;  %7241 = vst [vmem:[#allocation55_spill] sm:$0xff] %v5851_v55  ;;  %v5855_v36 = vsub.f32 %v66_v39, %v2126_v63  ;;  %v2146_v39 = vand.u32 4294901760, %v76_v30  ;;  %v5879_v7 = vpack.c.bf16 %v2144_v60, %v2140_v29  ;;  %v5881_v56 = vsub.f32 %v72_v47, %v2138_v37 }
  0xd4   :  { %4530 = vmatpush1.bf16.msra.mxu0 %v5826_v12  ;;  %7242 = vst [vmem:[#allocation56_spill] sm:$0xff] %v5853_v27  ;;  %v78_v12 = vld [vmem:[#allocation2 + $0x158] sm:$0xff]  ;;  %7246 = vst [vmem:[#allocation60_spill] sm:$0xff] %v5861_v0  ;;  %v5873_v0 = vsub.f32 %v67_v44, %v2132_v28  ;;  %v5877_v50 = vpack.c.bf16 %v2142_v22, %v2138_v37  ;;  %v5883_v45 = vsub.f32 %v74_v43, %v2142_v22 }
  0xd5   :  { %4532 = vmatprep.subr.bf16.mxu0 %v5831_v57  ;;  %7243 = vst [vmem:[#allocation57_spill] sm:$0xff] %v5855_v36  ;;  %7247 = vst [vmem:[#allocation61_spill] sm:$0xff] %v5864_v38  ;;  %v80_v57 = vld [vmem:[#allocation2 + $0x168] sm:$0xff]  ;;  %v82_v27 = vld [vmem:[#allocation2 + $0x178] sm:$0xff]  ;;  %v2150_v63 = vand.u32 4294901760, %v78_v12  ;;  %v5886_v36 = vsub.f32 %v71_v41, %v2140_v29  ;;  %v5888_v44 = vsub.f32 %v73_v49, %v2144_v60  ;;  %v2160_v28 = vand.u32 4294901760, %v81_v42 }
  0xd6   :  { %7248 = vst [vmem:[#allocation62_spill] sm:$0xff] %v5866_v3  ;;  %7249 = vst [vmem:[#allocation63_spill] sm:$0xff] %v5868_v17  ;;  %v2154_v17 = vand.u32 4294901760, %v80_v57  ;;  %v84_v3 = vld [vmem:[#allocation2 + $0x188] sm:$0xff]  ;;  %v5893_v22 = vsub.f32 %v76_v30, %v2146_v39  ;;  %v5897_v37 = vpack.c.bf16 %v2152_v1, %v2148_v19  ;;  %v5899_v29 = vsub.f32 %v75_v18, %v2148_v19 }
  0xd7   :  { %7250 = vst [vmem:[#allocation64_spill] sm:$0xff] %v5870_v61  ;;  %7251 = vst [vmem:[#allocation65_spill] sm:$0xff] %v5873_v0  ;;  %v5891_v47 = vpack.c.bf16 %v2150_v63, %v2146_v39  ;;  %v5895_v43 = vsub.f32 %v78_v12, %v2150_v63  ;;  %v5901_v60 = vsub.f32 %v77_v35, %v2152_v1  ;;  %v2162_v49 = vand.u32 4294901760, %v84_v3  ;;  %v92_v35 = vld [vmem:[#allocation2 + $0x1c8] sm:$0xff]  ;;  %v94_v1 = vld [vmem:[#allocation2 + $0x1d8] sm:$0xff] }
  0xd8   :  { %4534 = vmatpush1.bf16.msra.mxu0 %v5843_v25  ;;  %v5875_v25 = vsub.f32 %v69_v34, %v2136_v31  ;;  %7253 = vst [vmem:[#allocation67_spill] sm:$0xff] %v5877_v50  ;;  %7254 = vst [vmem:[#allocation68_spill] sm:$0xff] %v5879_v7  ;;  %v2156_v34 = vand.u32 4294901760, %v79_v26  ;;  %v83_v31 = vld [vmem:[#allocation2 + $0x180] sm:$0xff]  ;;  %v2166_v41 = vand.u32 4294901760, %v86_v4 }
  0xd9   :  { %4536 = vmatprep.subr.bf16.mxu0 %v5851_v55  ;;  %7255 = vst [vmem:[#allocation69_spill] sm:$0xff] %v5881_v56  ;;  %7256 = vst [vmem:[#allocation70_spill] sm:$0xff] %v5883_v45  ;;  %v2158_v55 = vand.u32 4294901760, %v82_v27  ;;  %v88_v45 = vld [vmem:[#allocation2 + $0x1a8] sm:$0xff]  ;;  %v2164_v30 = vand.u32 4294901760, %v83_v31 }
  0xda   :  { %7252 = vst [vmem:[#allocation66_spill] sm:$0xff] %v5875_v25  ;;  %7257 = vst [vmem:[#allocation71_spill] sm:$0xff] %v5886_v36  ;;  %v85_v25 = vld [vmem:[#allocation2 + $0x190] sm:$0xff]  ;;  %v5910_v63 = vpack.c.bf16 %v2160_v28, %v2156_v34  ;;  %v2170_v18 = vand.u32 4294901760, %v88_v45 }
  0xdb   :  { %7258 = vst [vmem:[#allocation72_spill] sm:$0xff] %v5888_v44  ;;  %7259 = vst [vmem:[#allocation73_spill] sm:$0xff] %v5891_v47  ;;  %v87_v44 = vld [vmem:[#allocation2 + $0x1a0] sm:$0xff]  ;;  %v89_v36 = vld [vmem:[#allocation2 + $0x1b0] sm:$0xff]  ;;  %v5903_v56 = vpack.c.bf16 %v2158_v55, %v2154_v17  ;;  %v2168_v39 = vand.u32 4294901760, %v85_v25  ;;  %v5908_v12 = vsub.f32 %v82_v27, %v2158_v55  ;;  %v5921_v55 = vsub.f32 %v86_v4, %v2166_v41 }
  0xdc   :  { %4538 = vmatpush1.bf16.msra.mxu0 %v5857_v16  ;;  %7260 = vst [vmem:[#allocation74_spill] sm:$0xff] %v5893_v22  ;;  %7261 = vst [vmem:[#allocation75_spill] sm:$0xff] %v5895_v43  ;;  %v90_v16 = vld [vmem:[#allocation2 + $0x1b8] sm:$0xff]  ;;  %v5919_v43 = vsub.f32 %v84_v3, %v2162_v49  ;;  %v5923_v27 = vsub.f32 %v83_v31, %v2164_v30  ;;  %v2178_v22 = vand.u32 4294901760, %v92_v35 }
  0xdd   :  { %4540 = vmatprep.subr.bf16.mxu0 %v5864_v38  ;;  %7262 = vst [vmem:[#allocation76_spill] sm:$0xff] %v5897_v37  ;;  %7263 = vst [vmem:[#allocation77_spill] sm:$0xff] %v5899_v29  ;;  %v5905_v38 = vsub.f32 %v80_v57, %v2154_v17  ;;  %v2174_v19 = vand.u32 4294901760, %v90_v16  ;;  %v5915_v29 = vsub.f32 %v81_v42, %v2160_v28  ;;  %v2172_v57 = vand.u32 4294901760, %v87_v44  ;;  %v96_v28 = vld [vmem:[#allocation2 + $0x1e8] sm:$0xff] }
  0xde   :  { %7264 = vst [vmem:[#allocation78_spill] sm:$0xff] %v5901_v60  ;;  %7265 = vst [vmem:[#allocation79_spill] sm:$0xff] %v5903_v56  ;;  %v5913_v60 = vsub.f32 %v79_v26, %v2156_v34  ;;  %v2176_v17 = vand.u32 4294901760, %v89_v36  ;;  %v91_v26 = vld [vmem:[#allocation2 + $0x1c0] sm:$0xff]  ;;  %v93_v34 = vld [vmem:[#allocation2 + $0x1d0] sm:$0xff]  ;;  %v5949_v4 = vsub.f32 %v92_v35, %v2178_v22  ;;  %v2186_v31 = vand.u32 4294901760, %v96_v28 }
  0xdf   :  { %7266 = vst [vmem:[#allocation80_spill] sm:$0xff] %v5905_v38  ;;  %7267 = vst [vmem:[#allocation81_spill] sm:$0xff] %v5908_v12  ;;  %v5917_v38 = vpack.c.bf16 %v2166_v41, %v2162_v49  ;;  %v5927_v12 = vsub.f32 %v85_v25, %v2168_v39  ;;  %v5930_v42 = vpack.c.bf16 %v2174_v19, %v2170_v18  ;;  %v2184_v3 = vand.u32 4294901760, %v93_v34 }
  0xe0   :  { %4542 = vmatpush1.bf16.msra.mxu0 %v5870_v61  ;;  %7268 = vst [vmem:[#allocation82_spill] sm:$0xff] %v5910_v63  ;;  %7269 = vst [vmem:[#allocation83_spill] sm:$0xff] %v5915_v29  ;;  %v5925_v61 = vpack.c.bf16 %v2168_v39, %v2164_v30  ;;  %v98_v29 = vld [vmem:[#allocation2 + $0x1f8] sm:$0xff]  ;;  %v5936_v25 = vsub.f32 %v88_v45, %v2170_v18  ;;  %v5938_v49 = vsub.f32 %v90_v16, %v2174_v19  ;;  %v95_v45 = vld [vmem:[#allocation2 + $0x1e0] sm:$0xff] }
  0xe1   :  { %4544 = vmatprep.subr.bf16.mxu0 %v5877_v50  ;;  %7270 = vst [vmem:[#allocation84_spill] sm:$0xff] %v5917_v38  ;;  %7271 = vst [vmem:[#allocation85_spill] sm:$0xff] %v5921_v55  ;;  %v2182_v50 = vand.u32 4294901760, %v94_v1  ;;  %v5940_v41 = vpack.c.bf16 %v2176_v17, %v2172_v57  ;;  %v7007_v30 = vand.u32 4294901760, %v5783_v33  ;;  %v5943_v39 = vsub.f32 %v87_v44, %v2172_v57  ;;  %v5951_v18 = vld [vmem:[#allocation2 + $0x1f0] sm:$0xff] }
  0xe2   :  { %7272 = vst [vmem:[#allocation86_spill] sm:$0xff] %v5923_v27  ;;  %7273 = vst [vmem:[#allocation87_spill] sm:$0xff] %v5925_v61  ;;  %v7278_v44 = vand.u32 4294901760, %v5769_v8  ;;  %v7279_v19 = vand.u32 4294901760, %v5777_v58 }
  0xe3   :  { %7274 = vst [vmem:[#allocation88_spill] sm:$0xff] %v5927_v12  ;;  %7275 = vst [vmem:[#allocation89_spill] sm:$0xff] %v5930_v42  ;;  %v2180_v12 = vand.u32 4294901760, %v91_v26  ;;  %v5947_v27 = vpack.c.bf16 %v2182_v50, %v2178_v22  ;;  %v5954_v16 = vsub.f32 %v94_v1, %v2182_v50  ;;  %v7280_v22 = vand.u32 4294901760, %v5780_v62 }
  0xe4   :  { %4546 = vmatpush1.bf16.msra.mxu0 %v5879_v7  ;;  %7276 = vst [vmem:[#allocation90_spill] sm:$0xff] %v5940_v41  ;;  %v5945_v7 = vsub.f32 %v89_v36, %v2176_v17  ;;  %v2214_v36 = vsub.f32 %v5769_v8, %v7278_v44  ;;  %v2226_v57 = vsub.f32 %v5777_v58, %v7279_v19  ;;  %v2188_v19 = vand.u32 4294901760, %v95_v45 }
  0xe5   :  { %4548 = vmatprep.subr.bf16.mxu0 %v5891_v47  ;;  %7277 = vst [vmem:[#allocation91_spill] sm:$0xff] %v5947_v27  ;;  %v2190_v47 = vand.u32 4294901760, %v98_v29  ;;  %v2220_v35 = vsub.f32 %v5780_v62, %v7280_v22  ;;  %v2232_v17 = vsub.f32 %v5783_v33, %v7007_v30  ;;  %v5974_v8 = vsub.f32 %v91_v26, %v2180_v12 }
  0xe6   :  { %v7014_v58 = vand.u32 4294901760, %v5951_v18  ;;  %v5977_v22 = vsub.f32 %v93_v34, %v2184_v3  ;;  %v5981_v62 = vsub.f32 %v96_v28, %v2186_v31  ;;  %v2215_v1 = vand.u32 4294901760, %v2214_v36 }
  0xe7   :  { %v5983_v30 = vsub.f32 %v98_v29, %v2190_v47  ;;  %v2227_v50 = vand.u32 4294901760, %v2226_v57  ;;  %v2221_v44 = vand.u32 4294901760, %v2220_v35  ;;  %v7284_v26 = vand.u32 4294901760, %v5786_v24 }
  0xe8   :  { %4550 = vmatpush1.bf16.msra.mxu0 %v5897_v37  ;;  %v5972_v37 = vpack.c.bf16 %v2184_v3, %v2180_v12  ;;  %v2233_v12 = vand.u32 4294901760, %v2232_v17  ;;  %v7285_v3 = vand.u32 4294901760, %v5789_v5  ;;  %v7289_v57 = vand.u32 4294901760, %v5793_v46 }
  0xe9   :  { %4552 = vmatprep.subr.bf16.mxu0 %v5903_v56  ;;  %v5979_v56 = vpack.c.bf16 %v2190_v47, %v2186_v31  ;;  %7283 = vst [vmem:[#allocation94_spill] sm:$0xff] %v5983_v30  ;;  %v2238_v34 = vsub.f32 %v5786_v24, %v7284_v26  ;;  %v7286_v47 = vand.u32 4294901760, %v5791_v13  ;;  %v6010_v31 = vsub.f32 %v95_v45, %v2188_v19 }
  0xea   :  { %7281 = vst [vmem:[#allocation92_spill] sm:$0xff] %v5972_v37  ;;  %v2250_v28 = vsub.f32 %v5789_v5, %v7285_v3  ;;  %v4571_v36 = vpack.c.bf16 %v2227_v50, %v2215_v1  ;;  %v2256_v35 = vsub.f32 %v5793_v46, %v7289_v57  ;;  %v6016_v26 = vpack.c.bf16 %v2233_v12, %v2221_v44 }
  0xeb   :  { %7282 = vst [vmem:[#allocation93_spill] sm:$0xff] %v5979_v56  ;;  %v2244_v29 = vsub.f32 %v5791_v13, %v7286_v47  ;;  %v6008_v47 = vpack.c.bf16 %v7014_v58, %v2188_v19  ;;  %7288 = vst [vmem:[#allocation96_spill] sm:$0xff] %v6010_v31  ;;  %v2239_v33 = vand.u32 4294901760, %v2238_v34  ;;  %v7291_v58 = vand.u32 4294901760, %v5797_v14 }
  0xec   :  { %4554 = vmatpush1.bf16.msra.mxu0 %v5910_v63  ;;  %v2251_v17 = vand.u32 4294901760, %v2250_v28  ;;  %v7292_v50 = vand.u32 4294901760, %v5802_v6  ;;  %v7293_v19 = vand.u32 4294901760, %v5807_v23  ;;  %v7294_v12 = vand.u32 4294901760, %v5809_v10 }
  0xed   :  { %4556 = vmatprep.subr.bf16.mxu0 %v5917_v38  ;;  %7287 = vst [vmem:[#allocation95_spill] sm:$0xff] %v6008_v47  ;;  %v2245_v3 = vand.u32 4294901760, %v2244_v29  ;;  %v2274_v45 = vsub.f32 %v5797_v14, %v7291_v58  ;;  %v7295_v28 = vand.u32 4294901760, %v5811_v15  ;;  %v7296_v29 = vand.u32 4294901760, %v5813_v54 }
  0xee   :  { %v2268_v1 = vsub.f32 %v5802_v6, %v7292_v50  ;;  %v2280_v44 = vsub.f32 %v5807_v23, %v7293_v19  ;;  %v2286_v34 = vsub.f32 %v5809_v10, %v7294_v12  ;;  %v7297_v57 = vand.u32 4294901760, %v5815_v59 }
  0xef   :  { %v2292_v58 = vsub.f32 %v5813_v54, %v7296_v29  ;;  %v7038_v54 = vand.u32 4294901760, %v5833_v32  ;;  %v7298_v63 = vand.u32 4294901760, %v5817_v2 }
  0xf0   :  { %4558 = vmatpush1.bf16.msra.mxu0 %v5925_v61  ;;  %v7290_v61 = vand.u32 4294901760, %v5795_v53  ;;  %v2304_v50 = vsub.f32 %v5815_v59, %v7297_v57  ;;  %v2275_v57 = vand.u32 4294901760, %v2274_v45  ;;  %v2269_v59 = vand.u32 4294901760, %v2268_v1 }
  0xf1   :  { %4560 = vmatprep.subr.bf16.mxu0 %v5930_v42  ;;  %v2257_v42 = vand.u32 4294901760, %v2256_v35  ;;  %v2287_v35 = vand.u32 4294901760, %v2286_v34  ;;  %v2293_v19 = vand.u32 4294901760, %v2292_v58  ;;  %v7302_v58 = vld [vmem:[#allocation50_spill] sm:$0xff] }
  0xf2   :  { %v2262_v38 = vsub.f32 %v5795_v53, %v7290_v61  ;;  %v2298_v61 = vsub.f32 %v5811_v15, %v7295_v28  ;;  %v4575_v28 = vpack.c.bf16 %v2251_v17, %v2239_v33  ;;  %v7035_v15 = vand.u32 4294901760, %v5824_v11 }
  0xf3   :  { %v2305_v30 = vand.u32 4294901760, %v2304_v50  ;;  %v4577_v12 = vpack.c.bf16 %v2257_v42, %v2245_v3  ;;  %v2310_v33 = vsub.f32 %v5817_v2, %v7298_v63  ;;  %v7299_v17 = vand.u32 4294901760, %v5819_v21  ;;  %v7339_v2 = vld [vmem:[#allocation81_spill] sm:$0xff] }
  0xf4   :  { %4562 = vmatpush1.bf16.msra.mxu0 %v5940_v41  ;;  %v2263_v10 = vand.u32 4294901760, %v2262_v38  ;;  %v2281_v41 = vand.u32 4294901760, %v2280_v44  ;;  %v2299_v31 = vand.u32 4294901760, %v2298_v61  ;;  %v7300_v38 = vand.u32 4294901760, %v5822_v9 }
  0xf5   :  { %4564 = vmatprep.subr.bf16.mxu0 %v5947_v27  ;;  %v2322_v29 = vsub.f32 %v5819_v21, %v7299_v17  ;;  %v2328_v1 = vsub.f32 %v5824_v11, %v7035_v15  ;;  %v7301_v42 = vand.u32 4294901760, %v5829_v51  ;;  %v2346_v63 = vsub.f32 %v5833_v32, %v7038_v54  ;;  %v7303_v17 = vld [vmem:[#allocation51_spill] sm:$0xff] }
  0xf6   :  { %v2316_v45 = vsub.f32 %v5822_v9, %v7300_v38  ;;  %v7043_v44 = vand.u32 4294901760, %v5835_v40  ;;  %v4579_v34 = vpack.c.bf16 %v2275_v57, %v2263_v10  ;;  %v7042_v38 = vand.u32 4294901760, %v7303_v17  ;;  %v7338_v9 = vld [vmem:[#allocation80_spill] sm:$0xff] }
  0xf7   :  { %v2334_v3 = vsub.f32 %v5829_v51, %v7301_v42  ;;  %v6076_v15 = vpack.c.bf16 %v2305_v30, %v2293_v19  ;;  %v7041_v42 = vand.u32 4294901760, %v5847_v48  ;;  %v2311_v27 = vand.u32 4294901760, %v2310_v33  ;;  %v7307_v33 = vld [vmem:[#allocation23_spill] sm:$0xff] }
  0xf8   :  { %4566 = vmatpush1.bf16.msra.mxu0 %v5972_v37  ;;  %v6074_v37 = vpack.c.bf16 %v2299_v31, %v2287_v35  ;;  %v2323_v54 = vand.u32 4294901760, %v2322_v29  ;;  %v2317_v32 = vand.u32 4294901760, %v2316_v45  ;;  %v7044_v10 = vand.u32 4294901760, %v5849_v20  ;;  %v7306_v29 = vld [vmem:[#allocation56_spill] sm:$0xff] }
  0xf9   :  { %4568 = vmatprep.subr.bf16.mxu0 %v5979_v56  ;;  %v4581_v56 = vpack.c.bf16 %v2281_v41, %v2269_v59  ;;  %v2329_v57 = vand.u32 4294901760, %v2328_v1  ;;  %v2335_v61 = vand.u32 4294901760, %v2334_v3  ;;  %v2347_v50 = vand.u32 4294901760, %v2346_v63  ;;  %v7311_v35 = vld [vmem:[#allocation60_spill] sm:$0xff] }
  0xfa   :  { %v6084_v59 = vsub.f32 %v5835_v40, %v7043_v44  ;;  %v7304_v41 = vand.u32 4294901760, %v5837_v52  ;;  %v7305_v31 = vand.u32 4294901760, %v7302_v58  ;;  %v6106_v45 = vsub.f32 %v5847_v48, %v7041_v42  ;;  %v7318_v44 = vld [vmem:[#allocation70_spill] sm:$0xff] }
  0xfb   :  { %v6124_v3 = vpack.c.bf16 %v2329_v57, %v2317_v32  ;;  %v6126_v1 = vpack.c.bf16 %v2347_v50, %v2335_v61  ;;  %v7313_v61 = vld [vmem:[#allocation62_spill] sm:$0xff]  ;;  %v7314_v57 = vld [vmem:[#allocation63_spill] sm:$0xff]  ;;  %v7317_v50 = vld [vmem:[#allocation69_spill] sm:$0xff]  ;;  %v7320_v48 = vand.u32 4294901760, %v7311_v35 }
  0xfc   :  { %4570 = vmatpush1.bf16.msra.mxu0 %v6008_v47  ;;  %v6089_v30 = vsub.f32 %v5837_v52, %v7304_v41  ;;  %v6094_v19 = vsub.f32 %v7302_v58, %v7305_v31  ;;  %v4587_v41 = vpack.c.bf16 %v2323_v54, %v2311_v27  ;;  %v6118_v31 = vsub.f32 %v5849_v20, %v7044_v10  ;;  %v7310_v54 = vld [vmem:[#allocation59_spill] sm:$0xff]  ;;  %v7316_v47 = vld [vmem:[#allocation66_spill] sm:$0xff] }
  0xfd   :  { %4572 = vmatprep.subr.bf16.mxu0 %v4571_v36  ;;  %v6099_v36 = vsub.f32 %v7303_v17, %v7042_v38  ;;  %v7309_v38 = vld [vmem:[#allocation18_spill] sm:$0xff]  ;;  %v7057_v27 = vand.u32 4294901760, %v7310_v54  ;;  %v7319_v20 = vld [vmem:[#allocation71_spill] sm:$0xff]  ;;  %v7324_v52 = vand.u32 4294901760, %v7313_v61  ;;  %v7328_v58 = vand.u32 4294901760, %v5873_v0 }
  0xfe   :  { %v2353_v63 = vand.u32 4294901760, %v6089_v30  ;;  %v2377_v30 = vand.u32 4294901760, %v6118_v31  ;;  %v7327_v40 = vld [vmem:[#allocation78_spill] sm:$0xff]  ;;  %v7330_v31 = vand.u32 4294901760, %v7317_v50 }
  0xff   :  { %2205 = vmatmul.mubr.f32.vlgmr.msra.gmra.mrb[10].mxu0 %v7307_v33  ;;  %v7308_v33 = vld [vmem:[#allocation57_spill] sm:$0xff] }
 0x100   :  { %4574 = vmatpush1.bf16.msra.mxu0 %v6016_v26  ;;  %2596 = vmatprep.mubr.f32.mxu0 %v7309_v38  ;;  %v7315_v10 = vand.u32 4294901760, %v7308_v33  ;;  %v7322_v26 = vld [vmem:[#allocation74_spill] sm:$0xff]  ;;  %v7323_v38 = vld [vmem:[#allocation75_spill] sm:$0xff]  ;;  %v2430_v51 = vsub.f32 %v7317_v50, %v7330_v31 }
 0x101   :  { %4576 = vmatprep.subr.bf16.mxu0 %v4575_v28  ;;  %v7312_v28 = vand.u32 4294901760, %v7306_v29  ;;  %v7335_v31 = vand.u32 4294901760, %v7323_v38 }
 0x102   :  { %v6146_v42 = vsub.f32 %v7308_v33, %v7315_v10  ;;  %v2400_v10 = vsub.f32 %v7311_v35, %v7320_v48  ;;  %v7321_v33 = vld [vmem:[#allocation72_spill] sm:$0xff]  ;;  %v7329_v35 = vand.u32 4294901760, %v7316_v47 }
 0x103   :  { %v6138_v32 = vsub.f32 %v7306_v29, %v7312_v28  ;;  %v2388_v28 = vsub.f32 %v7310_v54, %v7057_v27  ;;  %v2406_v27 = vsub.f32 %v7313_v61, %v7324_v52  ;;  %v7325_v29 = vand.u32 4294901760, %v7314_v57  ;;  %v7326_v54 = vld [vmem:[#allocation77_spill] sm:$0xff] }
 0x104   :  { %4578 = vmatpush1.bf16.msra.mxu0 %v4577_v12  ;;  %v2395_v17 = vand.u32 4294901760, %v6146_v42  ;;  %v2424_v52 = vsub.f32 %v7316_v47, %v7329_v35  ;;  %v7332_v42 = vand.u32 4294901760, %v7319_v20  ;;  %v7333_v61 = vand.u32 4294901760, %v7321_v33 }
 0x105   :  { %4580 = vmatprep.subr.bf16.mxu0 %v4579_v34  ;;  %v2418_v12 = vsub.f32 %v7314_v57, %v7325_v29  ;;  %v2383_v48 = vand.u32 4294901760, %v6138_v32  ;;  %v2412_v34 = vsub.f32 %v5873_v0, %v7328_v58  ;;  %v2389_v29 = vand.u32 4294901760, %v2388_v28 }
 0x106   :  { %v2436_v57 = vsub.f32 %v7319_v20, %v7332_v42  ;;  %v2401_v0 = vand.u32 4294901760, %v2400_v10  ;;  %v2448_v35 = vsub.f32 %v7321_v33, %v7333_v61  ;;  %v2466_v50 = vsub.f32 %v7323_v38, %v7335_v31 }
 0x107   :  { %v7336_v11 = vand.u32 4294901760, %v7326_v54  ;;  %v7337_v10 = vand.u32 4294901760, %v7327_v40  ;;  %v7090_v31 = vand.u32 4294901760, %v7338_v9 }
 0x108   :  { %4582 = vmatpush1.bf16.msra.mxu0 %v4581_v56  ;;  %v7331_v56 = vand.u32 4294901760, %v7318_v44  ;;  %v2437_v21 = vand.u32 4294901760, %v2436_v57  ;;  %v2449_v6 = vand.u32 4294901760, %v2448_v35 }
 0x109   :  { %4584 = vmatprep.subr.bf16.mxu0 %v6074_v37  ;;  %v7334_v37 = vand.u32 4294901760, %v7322_v26  ;;  %v2460_v42 = vsub.f32 %v7326_v54, %v7336_v11  ;;  %v2472_v20 = vsub.f32 %v7327_v40, %v7337_v10  ;;  %v7089_v11 = vand.u32 4294901760, %v7339_v2 }
 0x10a   :  { %v2442_v32 = vsub.f32 %v7318_v44, %v7331_v56  ;;  %v3957_v58 = vpop.f32.mrb[0].mxu0  ;;  %v2407_v56 = vand.u32 4294901760, %v2406_v27  ;;  %v2419_v44 = vand.u32 4294901760, %v2418_v12  ;;  %v2431_v27 = vand.u32 4294901760, %v2430_v51 }
 0x10b   :  { %v2454_v28 = vsub.f32 %v7322_v26, %v7334_v37  ;;  %v3958_v47 = vpop.f32.mrb[1].mxu0  ;;  %v2413_v37 = vand.u32 4294901760, %v2412_v34  ;;  %v2425_v26 = vand.u32 4294901760, %v2424_v52  ;;  %v2473_v34 = vand.u32 4294901760, %v2472_v20 }
 0x10c   :  { %v6203_v61 = vadd.f32 %v3958_v47, %v3957_v58  ;;  %v4062_v33 = vpop.f32.mrb[0].mxu1  ;;  %4586 = vmatpush1.bf16.msra.mxu0 %v6076_v15  ;;  %v2443_v12 = vand.u32 4294901760, %v2442_v32  ;;  %v2467_v47 = vand.u32 4294901760, %v2466_v50  ;;  %v7340_v58 = vand.u32 4294901760, %v6084_v59  ;;  %v7344_v59 = vld [vmem:[#allocation83_spill] sm:$0xff] }
 0x10d   :  { %v4063_v38 = vpop.f32.mrb[1].mxu1  ;;  %4588 = vmatprep.subr.bf16.mxu0 %v4587_v41  ;;  %v2455_v10 = vand.u32 4294901760, %v2454_v28  ;;  %v2461_v15 = vand.u32 4294901760, %v2460_v42  ;;  %v7088_v52 = vand.u32 4294901760, %v5913_v60  ;;  %v7341_v51 = vand.u32 4294901760, %v6094_v19 }
 0x10e   :  { %v6208_v54 = vadd.f32 %v4063_v38, %v4062_v33  ;;  %v4593_v40 = vpack.c.bf16 %v2353_v63, %v7340_v58  ;;  %v7342_v41 = vand.u32 4294901760, %v6099_v36  ;;  %v7343_v38 = vand.u32 4294901760, %v6106_v45 }
 0x10f   :  { %v6223_v50 = vsub.f32 %v7338_v9, %v7090_v31  ;;  %v7087_v63 = vand.u32 4294901760, %v7344_v59  ;;  %v4599_v20 = vpack.c.bf16 %v2395_v17, %v2383_v48  ;;  %v4601_v32 = vpack.c.bf16 %v2401_v0, %v2389_v29  ;;  %v1515_v0 = vld [vmem:[%s6866_s3 + $0x18] sm:$0xff]  ;;  %v1514_v48 = vld [vmem:[%s6866_s3 + $0x10] sm:$0xff] }
 0x110   :  { %4590 = vmatpush1.bf16.msra.mxu0 %v6124_v3  ;;  %v4595_v57 = vpack.c.bf16 %v7342_v41, %v7341_v51  ;;  %v4597_v33 = vpack.c.bf16 %v2377_v30, %v7343_v38  ;;  %v4603_v3 = vpack.c.bf16 %v2419_v44, %v2407_v56  ;;  %v6230_v19 = vsub.f32 %v7339_v2, %v7089_v11  ;;  %v1519_v51 = vld [vmem:[%s6866_s3 + $0x38] sm:$0xff] }
 0x111   :  { %4592 = vmatprep.subr.bf16.mxu0 %v6126_v1  ;;  %v6232_v36 = vpack.c.bf16 %v2425_v26, %v2413_v37  ;;  %v6234_v45 = vpack.c.bf16 %v2443_v12, %v2431_v27  ;;  %v6236_v30 = vpack.c.bf16 %v2449_v6, %v2437_v21  ;;  %v6238_v35 = vpack.c.bf16 %v2467_v47, %v2455_v10  ;;  %v1513_v1 = vld [vmem:[%s6866_s3 + $0x8] sm:$0xff]  ;;  %v1512_v6 = vld [vmem:[%s6866_s3] sm:$0xff] }
 0x112   :  { %v6246_v44 = vpack.c.bf16 %v2473_v34, %v2461_v15  ;;  %v6251_v17 = vsub.f32 %v5913_v60, %v7088_v52  ;;  %v1523_v26 = vand.u32 4294901760, %v1513_v1  ;;  %v1527_v21 = vand.u32 4294901760, %v1515_v0  ;;  %v1517_v34 = vld [vmem:[%s6866_s3 + $0x28] sm:$0xff] }
 0x113   :  { %v6263_v28 = vsub.f32 %v7344_v59, %v7087_v63  ;;  %v1525_v56 = vand.u32 4294901760, %v1512_v6  ;;  %v1529_v42 = vand.u32 4294901760, %v1514_v48  ;;  %v1535_v38 = vand.u32 4294901760, %v1519_v51 }
 0x114   :  { %4594 = vmatpush1.bf16.msra.mxu0 %v4593_v40  ;;  %v6266_v27 = vpack.c.bf16 %v1527_v21, %v1523_v26  ;;  %v6268_v12 = vsub.f32 %v1513_v1, %v1523_v26  ;;  %v6270_v10 = vsub.f32 %v1515_v0, %v1527_v21  ;;  %v1516_v1 = vld [vmem:[%s6866_s3 + $0x20] sm:$0xff]  ;;  %v1518_v0 = vld [vmem:[%s6866_s3 + $0x30] sm:$0xff] }
 0x115   :  { %4596 = vmatprep.subr.bf16.mxu0 %v4595_v57  ;;  %v6273_v47 = vpack.c.bf16 %v1529_v42, %v1525_v56  ;;  %v6275_v58 = vsub.f32 %v1512_v6, %v1525_v56  ;;  %v6277_v15 = vsub.f32 %v1514_v48, %v1529_v42  ;;  %v1531_v57 = vand.u32 4294901760, %v1517_v34  ;;  %v7350_v40 = vld [vmem:[#allocation88_spill] sm:$0xff] }
 0x116   :  { %7345 = vst [vmem:[#allocation23_spill] sm:$0xff] %v6266_v27  ;;  %4460 = vmatprep.subr.bf16.mxu1 %v6266_v27  ;;  %v7092_v26 = vand.u32 4294901760, %v6268_v12  ;;  %v1533_v21 = vand.u32 4294901760, %v1516_v1  ;;  %v1537_v6 = vand.u32 4294901760, %v1518_v0  ;;  %v7091_v48 = vand.u32 4294901760, %v6270_v10 }
 0x117   :  { %7346 = vst [vmem:[#allocation80_spill] sm:$0xff] %v6273_v47  ;;  %4462 = vmatpush1.bf16.msra.mxu1 %v6273_v47  ;;  %v7093_v56 = vand.u32 4294901760, %v6275_v58  ;;  %v6297_v42 = vpack.c.bf16 %v1535_v38, %v1531_v57  ;;  %v6299_v63 = vsub.f32 %v1517_v34, %v1531_v57  ;;  %v6301_v52 = vsub.f32 %v1519_v51, %v1535_v38 }
 0x118   :  { %4598 = vmatpush1.bf16.msra.mxu0 %v4597_v33  ;;  %v1610_v11 = vsub.f32 %v6268_v12, %v7092_v26  ;;  %v7348_v33 = vld [vmem:[#allocation86_spill] sm:$0xff]  ;;  %v6307_v37 = vpack.c.bf16 %v1537_v6, %v1533_v21  ;;  %v6309_v29 = vsub.f32 %v1516_v1, %v1533_v21  ;;  %v6311_v41 = vsub.f32 %v1518_v0, %v1537_v6 }
 0x119   :  { %4600 = vmatprep.subr.bf16.mxu0 %v4599_v20  ;;  %7347 = vst [vmem:[#allocation83_spill] sm:$0xff] %v6297_v42  ;;  %4464 = vmatprep.subr.bf16.mxu1 %v6297_v42  ;;  %v1622_v51 = vsub.f32 %v6270_v10, %v7091_v48  ;;  %v1616_v57 = vsub.f32 %v6275_v58, %v7093_v56  ;;  %v7351_v38 = vand.u32 4294901760, %v5919_v43  ;;  %v7094_v0 = vand.u32 4294901760, %v6277_v15 }
 0x11a   :  { %7349 = vst [vmem:[#allocation86_spill] sm:$0xff] %v6307_v37  ;;  %v1611_v34 = vand.u32 4294901760, %v1610_v11  ;;  %v7095_v21 = vand.u32 4294901760, %v6299_v63  ;;  %v7100_v11 = vand.u32 4294901760, %v6301_v52  ;;  %v7101_v26 = vand.u32 4294901760, %v6309_v29 }
 0x11b   :  { %v2502_v1 = vsub.f32 %v5919_v43, %v7351_v38  ;;  %4466 = vmatpush1.bf16.msra.mxu1 %v6307_v37  ;;  %v1623_v48 = vand.u32 4294901760, %v1622_v51  ;;  %v1617_v56 = vand.u32 4294901760, %v1616_v57  ;;  %v1628_v38 = vsub.f32 %v6277_v15, %v7094_v0 }
 0x11c   :  { %4602 = vmatpush1.bf16.msra.mxu0 %v4601_v32  ;;  %v7102_v32 = vand.u32 4294901760, %v6311_v41  ;;  %v1634_v20 = vsub.f32 %v6299_v63, %v7095_v21  ;;  %v1640_v31 = vsub.f32 %v6309_v29, %v7101_v26  ;;  %v7352_v0 = vand.u32 4294901760, %v5921_v55 }
 0x11d   :  { %4604 = vmatprep.subr.bf16.mxu0 %v4603_v3  ;;  %v1646_v3 = vsub.f32 %v6301_v52, %v7100_v11  ;;  %v4467_v51 = vpack.c.bf16 %v1623_v48, %v1611_v34  ;;  %v1629_v37 = vand.u32 4294901760, %v1628_v38  ;;  %v7353_v48 = vand.u32 4294901760, %v7348_v33 }
 0x11e   :  { %v1652_v57 = vsub.f32 %v6311_v41, %v7102_v32  ;;  %v2514_v21 = vsub.f32 %v5921_v55, %v7352_v0  ;;  %v1635_v42 = vand.u32 4294901760, %v1634_v20  ;;  %v7354_v26 = vand.u32 4294901760, %v7350_v40 }
 0x11f   :  { %v1647_v11 = vand.u32 4294901760, %v1646_v3  ;;  %v2508_v34 = vsub.f32 %v7348_v33, %v7353_v48  ;;  %4468 = vmatprep.subr.bf16.mxu1 %v4467_v51  ;;  %v1641_v32 = vand.u32 4294901760, %v1640_v31  ;;  %v7355_v47 = vand.u32 4294901760, %v5936_v25 }
 0x120   :  { %4606 = vmatpush1.bf16.msra.mxu0 %v6232_v36  ;;  %v2520_v6 = vsub.f32 %v7350_v40, %v7354_v26  ;;  %v1653_v36 = vand.u32 4294901760, %v1652_v57  ;;  %v7109_v20 = vand.u32 4294901760, %v5943_v39  ;;  %v6362_v38 = vpack.c.bf16 %v1629_v37, %v1617_v56 }
 0x121   :  { %4608 = vmatprep.subr.bf16.mxu0 %v6234_v45  ;;  %v2526_v0 = vsub.f32 %v5936_v25, %v7355_v47  ;;  %v6364_v45 = vpack.c.bf16 %v1647_v11, %v1635_v42  ;;  %v2485_v3 = vand.u32 4294901760, %v6251_v17  ;;  %v7357_v48 = vand.u32 4294901760, %v5938_v49 }
 0x122   :  { %v7107_v26 = vand.u32 4294901760, %v5945_v7  ;;  %v6371_v31 = vpack.c.bf16 %v1653_v36, %v1641_v32  ;;  %v2497_v47 = vand.u32 4294901760, %v6263_v28  ;;  %v2503_v51 = vand.u32 4294901760, %v2502_v1 }
 0x123   :  { %7356 = vst [vmem:[#allocation88_spill] sm:$0xff] %v6364_v45  ;;  %v2538_v27 = vsub.f32 %v5938_v49, %v7357_v48  ;;  %v2515_v57 = vand.u32 4294901760, %v2514_v21  ;;  %v7108_v37 = vand.u32 4294901760, %v5949_v4  ;;  %v7359_v56 = vand.u32 4294901760, %v5951_v18 }
 0x124   :  { %7358 = vst [vmem:[#allocation97_spill] sm:$0xff] %v6371_v31  ;;  %4610 = vmatpush1.bf16.msra.mxu0 %v6236_v30  ;;  %v7361_v42 = vand.u32 4294901760, %v6223_v50  ;;  %v7362_v11 = vand.u32 4294901760, %v6230_v19  ;;  %v7110_v30 = vand.u32 4294901760, %v5954_v16  ;;  %v2509_v1 = vand.u32 4294901760, %v2508_v34 }
 0x125   :  { %v6379_v17 = vsub.f32 %v5951_v18, %v7359_v56  ;;  %4612 = vmatprep.subr.bf16.mxu0 %v6238_v35  ;;  %v2521_v21 = vand.u32 4294901760, %v2520_v6  ;;  %v2527_v36 = vand.u32 4294901760, %v2526_v0  ;;  %v2532_v18 = vsub.f32 %v5943_v39, %v7109_v20 }
 0x126   :  { %v4615_v32 = vpack.c.bf16 %v7362_v11, %v7361_v42  ;;  %v2539_v48 = vand.u32 4294901760, %v2538_v27  ;;  %v2544_v50 = vsub.f32 %v5945_v7, %v7107_v26  ;;  %v7112_v19 = vand.u32 4294901760, %v5974_v8  ;;  %v7363_v11 = vld [vmem:[#allocation94_spill] sm:$0xff]  ;;  %v7364_v26 = vld [vmem:[#allocation96_spill] sm:$0xff] }
 0x127   :  { %7360 = vst [vmem:[#allocation98_spill] sm:$0xff] %v6379_v17  ;;  %v4617_v56 = vpack.c.bf16 %v2497_v47, %v2485_v3  ;;  %v4619_v34 = vpack.c.bf16 %v2515_v57, %v2503_v51  ;;  %v2550_v6 = vsub.f32 %v5949_v4, %v7108_v37  ;;  %v7111_v0 = vand.u32 4294901760, %v5977_v22 }
 0x128   :  { %4614 = vmatpush1.bf16.msra.mxu0 %v6246_v44  ;;  %v2562_v27 = vsub.f32 %v5954_v16, %v7110_v30  ;;  %v7113_v42 = vand.u32 4294901760, %v5981_v62  ;;  %v4621_v47 = vpack.c.bf16 %v2521_v21, %v2509_v1  ;;  %v4623_v37 = vpack.c.bf16 %v2539_v48, %v2527_v36 }
 0x129   :  { %4616 = vmatprep.subr.bf16.mxu0 %v4615_v32  ;;  %v2533_v20 = vand.u32 4294901760, %v2532_v18  ;;  %v2545_v32 = vand.u32 4294901760, %v2544_v50  ;;  %v2556_v30 = vsub.f32 %v5974_v8, %v7112_v19  ;;  %v2568_v44 = vsub.f32 %v5977_v22, %v7111_v0 }
 0x12a   :  { %v3992_v3 = vpop.f32.mrb[2].mxu0  ;;  %v7114_v1 = vand.u32 4294901760, %v7364_v26  ;;  %v2551_v36 = vand.u32 4294901760, %v2550_v6  ;;  %v2563_v18 = vand.u32 4294901760, %v2562_v27  ;;  %v2574_v48 = vsub.f32 %v5981_v62, %v7113_v42 }
 0x12b   :  { %v3993_v57 = vpop.f32.mrb[3].mxu0  ;;  %v7365_v50 = vand.u32 4294901760, %v7363_v11  ;;  %v4625_v0 = vpack.c.bf16 %v2545_v32, %v2533_v20  ;;  %v2557_v19 = vand.u32 4294901760, %v2556_v30  ;;  %v2569_v21 = vand.u32 4294901760, %v2568_v44 }
 0x12c   :  { %v3994_v35 = vadd.f32 %v3993_v57, %v3992_v3  ;;  %4618 = vmatpush1.bf16.msra.mxu0 %v4617_v56  ;;  %v7366_v6 = vand.u32 4294901760, %v6379_v17  ;;  %v4627_v42 = vpack.c.bf16 %v2563_v18, %v2551_v36  ;;  %v2575_v31 = vand.u32 4294901760, %v2574_v48 }
 0x12d   :  { %4620 = vmatprep.subr.bf16.mxu0 %v4619_v34  ;;  %v2586_v56 = vsub.f32 %v7363_v11, %v7365_v50  ;;  %v2580_v34 = vsub.f32 %v7364_v26, %v7114_v1  ;;  %v7367_v44 = vand.u32 4294901760, %v6268_v12  ;;  %v7370_v32 = vand.u32 4294901760, %v6277_v15 }
 0x12e   :  { %v506_v3 = vadd.f32 %v3994_v35, %v6203_v61  ;;  %v2592_v27 = vsub.f32 %v6379_v17, %v7366_v6  ;;  %v4629_v61 = vpack.c.bf16 %v2569_v21, %v2557_v19  ;;  %v7371_v19 = vld [vmem:[#allocation24_spill] sm:$0xff]  ;;  %v7372_v21 = vld [vmem:[#allocation27_spill] sm:$0xff]  ;;  %v7374_v18 = vand.u32 4294901760, %v6301_v52 }
 0x12f   :  { %v2587_v50 = vand.u32 4294901760, %v2586_v56  ;;  %v2581_v20 = vand.u32 4294901760, %v2580_v34  ;;  %v7375_v56 = vand.u32 4294901760, %v6309_v29  ;;  %v7376_v34 = vand.u32 4294901760, %v6311_v41 }
 0x130   :  { %v4132_v28 = vpop.f32.mrb[2].mxu1  ;;  %4622 = vmatpush1.bf16.msra.mxu0 %v4621_v47  ;;  %v7368_v47 = vand.u32 4294901760, %v6270_v10 }
 0x131   :  { %v4133_v51 = vpop.f32.mrb[3].mxu1  ;;  %4624 = vmatprep.subr.bf16.mxu0 %v4623_v37  ;;  %v4631_v30 = vpack.c.bf16 %v2587_v50, %v2575_v31  ;;  %v7369_v37 = vand.u32 4294901760, %v6275_v58  ;;  %v7373_v31 = vand.u32 4294901760, %v6299_v63  ;;  %v6461_v6 = vpack.c.bf16 %v7376_v34, %v7375_v56  ;;  %v7378_v50 = vld [vmem:[#allocation29_spill] sm:$0xff]  ;;  %v7390_v34 = vld [vmem:[#allocation40_spill] sm:$0xff] }
 0x132   :  { %v6427_v57 = vadd.f32 %v4133_v51, %v4132_v28  ;;  %v2593_v28 = vand.u32 4294901760, %v2592_v27  ;;  %v6441_v51 = vpack.c.bf16 %v7368_v47, %v7367_v44  ;;  %v7377_v27 = vld [vmem:[#allocation28_spill] sm:$0xff]  ;;  %v7383_v44 = vpack.c.bf16 %v5797_v14, %v5795_v53 }
 0x133   :  { %v6447_v36 = vpack.c.bf16 %v7370_v32, %v7369_v37  ;;  %v6455_v48 = vpack.c.bf16 %v7374_v18, %v7373_v31  ;;  %v7384_v47 = vld [vmem:[#allocation36_spill] sm:$0xff]  ;;  %v7385_v37 = vld [vmem:[#allocation37_spill] sm:$0xff]  ;;  %v7388_v31 = vld [vmem:[#allocation38_spill] sm:$0xff] }
 0x134   :  { %4626 = vmatpush1.bf16.msra.mxu0 %v4625_v0  ;;  %v4633_v0 = vpack.c.bf16 %v2593_v28, %v2581_v20  ;;  %v7379_v20 = vld [vmem:[#allocation17_spill] sm:$0xff]  ;;  %v7380_v28 = vld [vmem:[#allocation20_spill] sm:$0xff]  ;;  %v4647_v32 = vpack.c.bf16 %v7385_v37, %v7384_v47  ;;  %v7389_v18 = vld [vmem:[#allocation39_spill] sm:$0xff] }
 0x135   :  { %4628 = vmatprep.subr.bf16.mxu0 %v4627_v42  ;;  %v4635_v42 = vpack.c.bf16 %v7372_v21, %v7371_v19  ;;  %v4649_v56 = vpack.c.bf16 %v7389_v18, %v7388_v31  ;;  %v7394_v37 = vld [vmem:[#allocation45_spill] sm:$0xff]  ;;  %v7395_v47 = vld [vmem:[#allocation47_spill] sm:$0xff]  ;;  %v7396_v18 = vld [vmem:[#allocation48_spill] sm:$0xff] }
 0x136   :  { %v4655_v53 = vpack.c.bf16 %v7395_v47, %v7394_v37 }
 0x138   :  { %v6435_v45 = vpop.f32.mrb[4].mxu1  ;;  %4630 = vmatpush1.bf16.msra.mxu0 %v4629_v61  ;;  %v4637_v61 = vpack.c.bf16 %v7378_v50, %v7377_v27 }
 0x139   :  { %v4175_v35 = vpop.f32.mrb[5].mxu1  ;;  %4632 = vmatprep.subr.bf16.mxu0 %v4631_v30  ;;  %v7381_v30 = vpack.c.bf16 %v5789_v5, %v5786_v24 }
 0x13a   :  { %v7382_v35 = vpack.c.bf16 %v5793_v46, %v5791_v13 }
 0x13c   :  { %4634 = vmatpush1.bf16.msra.mxu0 %v4633_v0  ;;  %v7386_v0 = vld [vmem:[#allocation33_spill] sm:$0xff] }
 0x13d   :  { %4636 = vmatprep.subr.bf16.mxu0 %v4635_v42  ;;  %v7387_v42 = vpack.c.bf16 %v5807_v23, %v7386_v0 }
 0x13f   :  { %2598 = vmatmul.mubr.f32.vlgmr.msra.gmra.mrb[10].mxu0 %v7379_v20  ;;  %v7392_v20 = vld [vmem:[#allocation42_spill] sm:$0xff] }
 0x140   :  { %4638 = vmatpush1.bf16.msra.mxu0 %v4637_v61  ;;  %2798 = vmatprep.mubr.f32.mxu0 %v7380_v28  ;;  %v7391_v61 = vld [vmem:[#allocation41_spill] sm:$0xff] }
 0x141   :  { %4640 = vmatprep.subr.bf16.mxu0 %v7381_v30  ;;  %v4651_v28 = vpack.c.bf16 %v7391_v61, %v7390_v34  ;;  %v7398_v61 = vld [vmem:[#allocation50_spill] sm:$0xff]  ;;  %v7399_v34 = vld [vmem:[#allocation51_spill] sm:$0xff] }
 0x142   :  { %v4659_v0 = vpack.c.bf16 %v7399_v34, %v7398_v61  ;;  %v7411_v61 = vld [vmem:[#allocation70_spill] sm:$0xff] }
 0x144   :  { %4642 = vmatpush1.bf16.msra.mxu0 %v7382_v35 }
 0x145   :  { %4644 = vmatprep.subr.bf16.mxu0 %v7383_v44  ;;  %v7393_v44 = vld [vmem:[#allocation43_spill] sm:$0xff] }
 0x146   :  { %v4653_v14 = vpack.c.bf16 %v7393_v44, %v7392_v20  ;;  %v7403_v44 = vld [vmem:[#allocation57_spill] sm:$0xff] }
 0x148   :  { %4646 = vmatpush1.bf16.msra.mxu0 %v7387_v42 }
 0x149   :  { %4648 = vmatprep.subr.bf16.mxu0 %v4647_v32  ;;  %v7397_v32 = vld [vmem:[#allocation49_spill] sm:$0xff] }
 0x14a   :  { %v4027_v30 = vpop.f32.mrb[4].mxu0  ;;  %v4657_v31 = vpack.c.bf16 %v7397_v32, %v7396_v18  ;;  %v7409_v18 = vld [vmem:[#allocation66_spill] sm:$0xff] }
 0x14b   :  { %v4028_v35 = vpop.f32.mrb[5].mxu0 }
 0x14c   :  { %v4029_v1 = vadd.f32 %v4028_v35, %v4027_v30  ;;  %4650 = vmatpush1.bf16.msra.mxu0 %v4649_v56  ;;  %v7400_v56 = vld [vmem:[#allocation53_spill] sm:$0xff]  ;;  %v7401_v30 = vld [vmem:[#allocation54_spill] sm:$0xff] }
 0x14d   :  { %4652 = vmatprep.subr.bf16.mxu0 %v4651_v28  ;;  %v4661_v35 = vpack.c.bf16 %v7401_v30, %v7400_v56  ;;  %v7402_v28 = vld [vmem:[#allocation56_spill] sm:$0xff] }
 0x14e   :  { %v644_v23 = vadd.f32 %v4029_v1, %v506_v3  ;;  %v4663_v20 = vpack.c.bf16 %v7403_v44, %v7402_v28  ;;  %v7404_v1 = vld [vmem:[#allocation59_spill] sm:$0xff]  ;;  %v7405_v3 = vld [vmem:[#allocation60_spill] sm:$0xff] }
 0x14f   :  { %v7413_v56 = vld [vmem:[#allocation72_spill] sm:$0xff]  ;;  %v7415_v28 = vld [vmem:[#allocation75_spill] sm:$0xff] }
 0x150   :  { %v752_v42 = vadd.f32 %v6208_v54, %v644_v23  ;;  %4654 = vmatpush1.bf16.msra.mxu0 %v4653_v14  ;;  %v4665_v23 = vpack.c.bf16 %v7405_v3, %v7404_v1  ;;  %v7406_v14 = vld [vmem:[#allocation62_spill] sm:$0xff]  ;;  %v7407_v54 = vld [vmem:[#allocation63_spill] sm:$0xff] }
 0x151   :  { %4656 = vmatprep.subr.bf16.mxu0 %v4655_v53  ;;  %v4667_v32 = vpack.c.bf16 %v7407_v54, %v7406_v14  ;;  %v7408_v53 = vld [vmem:[#allocation65_spill] sm:$0xff]  ;;  %v7417_v1 = vld [vmem:[#allocation78_spill] sm:$0xff] }
 0x152   :  { %v4669_v34 = vpack.c.bf16 %v7409_v18, %v7408_v53 }
 0x154   :  { %4658 = vmatpush1.bf16.msra.mxu0 %v4657_v31  ;;  %v7410_v31 = vld [vmem:[#allocation69_spill] sm:$0xff] }
 0x155   :  { %4660 = vmatprep.subr.bf16.mxu0 %v4659_v0  ;;  %v4671_v30 = vpack.c.bf16 %v7411_v61, %v7410_v31  ;;  %v7412_v0 = vld [vmem:[#allocation71_spill] sm:$0xff] }
 0x156   :  { %v4673_v44 = vpack.c.bf16 %v7413_v56, %v7412_v0 }
 0x158   :  { %4662 = vmatpush1.bf16.msra.mxu0 %v4661_v35  ;;  %v7414_v35 = vld [vmem:[#allocation74_spill] sm:$0xff] }
 0x159   :  { %4664 = vmatprep.subr.bf16.mxu0 %v4663_v20  ;;  %v4675_v3 = vpack.c.bf16 %v7415_v28, %v7414_v35  ;;  %v7416_v20 = vld [vmem:[#allocation77_spill] sm:$0xff] }
 0x15a   :  { %v4677_v54 = vpack.c.bf16 %v7417_v1, %v7416_v20 }
 0x15c   :  { %4666 = vmatpush1.bf16.msra.mxu0 %v4665_v23  ;;  %v4679_v23 = vpack.c.bf16 %v7339_v2, %v7338_v9 }
 0x15d   :  { %4668 = vmatprep.subr.bf16.mxu0 %v4667_v32  ;;  %v4681_v32 = vpack.c.bf16 %v7344_v59, %v5913_v60 }
 0x160   :  { %4670 = vmatpush1.bf16.msra.mxu0 %v4669_v34  ;;  %v4683_v34 = vpack.c.bf16 %v5921_v55, %v5919_v43  ;;  %v4691_v55 = vpack.c.bf16 %v5954_v16, %v5949_v4 }
 0x161   :  { %4672 = vmatprep.subr.bf16.mxu0 %v4671_v30 }
 0x164   :  { %4674 = vmatpush1.bf16.msra.mxu0 %v4673_v44  ;;  %v4685_v44 = vpack.c.bf16 %v7350_v40, %v7348_v33 }
 0x165   :  { %4676 = vmatprep.subr.bf16.mxu0 %v4675_v3  ;;  %v4687_v3 = vpack.c.bf16 %v5938_v49, %v5936_v25 }
 0x168   :  { %4678 = vmatpush1.bf16.msra.mxu0 %v4677_v54 }
 0x169   :  { %4680 = vmatprep.subr.bf16.mxu0 %v4679_v23  ;;  %v4689_v23 = vpack.c.bf16 %v5945_v7, %v5943_v39 }
 0x16a   :  { %v4097_v30 = vpop.f32.mrb[6].mxu0 }
 0x16b   :  { %v4098_v56 = vpop.f32.mrb[7].mxu0 }
 0x16c   :  { %v4099_v0 = vadd.f32 %v4098_v56, %v4097_v30  ;;  %4682 = vmatpush1.bf16.msra.mxu0 %v4681_v32  ;;  %v4693_v32 = vpack.c.bf16 %v5977_v22, %v5974_v8 }
 0x16d   :  { %4684 = vmatprep.subr.bf16.mxu0 %v4683_v34 }
 0x16e   :  { %v920_v2 = vadd.f32 %v4099_v0, %v752_v42  ;;  %v4695_v42 = vpack.c.bf16 %v7363_v11, %v5981_v62 }
 0x170   :  { %v1024_v54 = vadd.f32 %v6427_v57, %v920_v2  ;;  %4686 = vmatpush1.bf16.msra.mxu0 %v4685_v44  ;;  %v4697_v2 = vpack.c.bf16 %v6379_v17, %v7364_v26  ;;  %v7418_v57 = vld [vmem:[#allocation19_spill] sm:$0xff]  ;;  %v7420_v17 = vld [vmem:[#allocation88_spill] sm:$0xff] }
 0x171   :  { %4688 = vmatprep.subr.bf16.mxu0 %v4687_v3 }
 0x172   :  { %v1103_v56 = vadd.f32 %v6435_v45, %v1024_v54 }
 0x174   :  { %4690 = vmatpush1.bf16.msra.mxu0 %v4689_v23 }
 0x175   :  { %4692 = vmatprep.subr.bf16.mxu0 %v4691_v55 }
 0x178   :  { %4694 = vmatpush1.bf16.msra.mxu0 %v4693_v32  ;;  %v7419_v32 = vmov 0.0  }
 0x179   :  { %4696 = vmatprep.subr.bf16.mxu0 %v4695_v42  ;;  %v7421_v42 = vld [vmem:[#allocation97_spill] sm:$0xff] }
 0x17c   :  { %4698 = vmatpush1.bf16.msra.mxu0 %v4697_v2  ;;  %v7423_v2 = vpack.c.bf16 %v6277_v15, %v6275_v58  ;;  %v7429_v58 = vld [vmem:[#allocation86_spill] sm:$0xff] }
 0x17d   :  { %v7433_v15 = vld [vmem:[#allocation6_spill] sm:$0xff] }
 0x17f   :  { %2801 = vmatmul.mubr.f32.vlgmr.msra.gmra.mrb[10].mxu0 %v7418_v57  ;;  %v7426_v57 = vld [vmem:[#allocation23_spill] sm:$0xff] }
 0x192   :  { %v1508_v0 = vpop.f32.mrb[8].mxu0 }
 0x193   :  { %v4940_v34 = vadd.f32 %v1508_v0, %v1103_v56  ;;  %v4230_v30 = vpop.f32.mrb[9].mxu0  ;;  %v7422_v56 = vpack.c.bf16 %v6270_v10, %v6268_v12  ;;  %v7427_v12 = vld [vmem:[#allocation80_spill] sm:$0xff]  ;;  %v7428_v10 = vld [vmem:[#allocation83_spill] sm:$0xff]  ;;  %v7439_v0 = vld [vmem:[#allocation26_spill] sm:$0xff] }
 0x194   :  { %v7441_v30 = vld [vmem:[#allocation34_spill] sm:$0xff] }
 0x195   :  { %v1521_v45 = vsel %vm162_vm0, %v4940_v34, 0  ;;  %v7440_v34 = vld [vmem:[#allocation32_spill] sm:$0xff] }
 0x196   :  { %v1596_v44 = vand.u32 4294901760, %v1521_v45 }
 0x198   :  { %v1597_v3 = vsub.f32 %v1521_v45, %v1596_v44  ;;  %v7442_v45 = vld [vmem:[#allocation44_spill] sm:$0xff] }
 0x19a   :  { %v1598_v54 = vand.u32 4294901760, %v1597_v3 }
 0x19c   :  { %v1599_v55 = vsub.f32 %v1597_v3, %v1598_v54 }
 0x19e   :  { %v1600_v23 = vand.u32 4294901760, %v1599_v55  ;;  %v7446_v55 = vld [vmem:[#allocation58_spill] sm:$0xff] }
 0x1a0   :  { %1601 = vmatmul.mubr.f32.vlgmr.msra.gmra.mrb[6].mxu1 %v1600_v23  ;;  %v7447_v23 = vld [vmem:[#allocation61_spill] sm:$0xff] }
 0x1a1   :  { %4470 = vmatpush1.bf16.msra.mxu1 %v6362_v38  ;;  %1711 = vmatprep.mubr.f32.mxu1 %v7419_v32  ;;  %v7424_v38 = vpack.c.bf16 %v6301_v52, %v6299_v63  ;;  %v7430_v52 = vld [vmem:[#allocation13_spill] sm:$0xff]  ;;  %v7431_v63 = vld [vmem:[#allocation14_spill] sm:$0xff] }
 0x1a2   :  { %4472 = vmatprep.subr.bf16.mxu1 %v7420_v17  ;;  %v7425_v17 = vpack.c.bf16 %v6311_v41, %v6309_v29  ;;  %v7432_v29 = vld [vmem:[#allocation22_spill] sm:$0xff]  ;;  %v7434_v41 = vld [vmem:[#allocation15_spill] sm:$0xff] }
 0x1a5   :  { %4474 = vmatpush1.bf16.msra.mxu1 %v7421_v42  ;;  %v7448_v42 = vld [vmem:[#allocation64_spill] sm:$0xff] }
 0x1a6   :  { %4476 = vmatprep.subr.bf16.mxu1 %v7422_v56  ;;  %v7449_v56 = vld [vmem:[#allocation67_spill] sm:$0xff] }
 0x1a8   :  { %1713 = vmatmul.mubr.f32.vlgmr.msra.gmra.mrb[6].mxu1 %v1596_v44 }
 0x1a9   :  { %4478 = vmatpush1.bf16.msra.mxu1 %v7423_v2  ;;  %1799 = vmatprep.mubr.f32.mxu1 %v7419_v32  ;;  %v7450_v2 = vld [vmem:[#allocation68_spill] sm:$0xff] }
 0x1aa   :  { %4480 = vmatprep.subr.bf16.mxu1 %v7424_v38  ;;  %v7451_v38 = vld [vmem:[#allocation73_spill] sm:$0xff] }
 0x1ad   :  { %4482 = vmatpush1.bf16.msra.mxu1 %v7425_v17  ;;  %v7452_v17 = vld [vmem:[#allocation76_spill] sm:$0xff] }
 0x1ae   :  { %4484 = vmatprep.subr.bf16.mxu1 %v7426_v57 }
 0x1b0   :  { %1802 = vmatmul.mubr.f32.vlgmr.msra.gmra.mrb[6].mxu1 %v1597_v3  ;;  %v7444_v3 = vld [vmem:[#allocation52_spill] sm:$0xff] }
 0x1b1   :  { %4486 = vmatpush1.bf16.msra.mxu1 %v7427_v12  ;;  %1880 = vmatprep.mubr.f32.mxu1 %v7419_v32 }
 0x1b2   :  { %4488 = vmatprep.subr.bf16.mxu1 %v7428_v10 }
 0x1b5   :  { %4490 = vmatpush1.bf16.msra.mxu1 %v7429_v58 }
 0x1b6   :  { %4492 = vmatprep.subr.bf16.mxu1 %v6441_v51  ;;  %v7435_v51 = vld [vmem:[#allocation16_spill] sm:$0xff] }
 0x1b8   :  { %1884 = vmatmul.mubr.f32.vlgmr.msra.gmra.mrb[6].mxu1 %v1598_v54  ;;  %v7445_v54 = vld [vmem:[#allocation55_spill] sm:$0xff] }
 0x1b9   :  { %4494 = vmatpush1.bf16.msra.mxu1 %v6447_v36  ;;  %1978 = vmatprep.mubr.f32.mxu1 %v7419_v32  ;;  %v7436_v36 = vld [vmem:[#allocation25_spill] sm:$0xff] }
 0x1ba   :  { %4496 = vmatprep.subr.bf16.mxu1 %v6455_v48  ;;  %v7437_v48 = vld [vmem:[#allocation7_spill] sm:$0xff] }
 0x1bd   :  { %4498 = vmatpush1.bf16.msra.mxu1 %v6461_v6  ;;  %v7438_v6 = vld [vmem:[#allocation8_spill] sm:$0xff] }
 0x1be   :  { %4500 = vmatprep.subr.bf16.mxu1 %v7426_v57  ;;  %v7453_v57 = vld [vmem:[#allocation79_spill] sm:$0xff] }
 0x1c0   :  { %1980 = vmatmul.mubr.f32.vlgmr.msra.gmra.mrb[6].mxu1 %v1596_v44 }
 0x1c1   :  { %4502 = vmatpush1.bf16.msra.mxu1 %v7427_v12  ;;  %2058 = vmatprep.mubr.f32.mxu1 %v7419_v32  ;;  %v7454_v12 = vld [vmem:[#allocation82_spill] sm:$0xff] }
 0x1c2   :  { %4504 = vmatprep.subr.bf16.mxu1 %v7428_v10  ;;  %v7455_v10 = vld [vmem:[#allocation84_spill] sm:$0xff]  ;;  %v7458_v32 = vld [vmem:[#allocation90_spill] sm:$0xff] }
 0x1c5   :  { %4506 = vmatpush1.bf16.msra.mxu1 %v7429_v58  ;;  %v7456_v58 = vld [vmem:[#allocation87_spill] sm:$0xff] }
 0x1c6   :  { %4700 = vmatprep.subr.bf16.mxu1 %v7430_v52 }
 0x1c8   :  { %2060 = vmatmul.mubr.f32.vlgmr.msra.gmra.mrb[6].mxu1 %v1596_v44  ;;  %v7443_v44 = vld [vmem:[#allocation46_spill] sm:$0xff] }
 0x1c9   :  { %4702 = vmatpush1.bf16.msra.mxu1 %v7431_v63  ;;  %2938 = vmatprep.mubr.f32.mxu1 %v7432_v29  ;;  %v7457_v29 = vld [vmem:[#allocation89_spill] sm:$0xff] }
 0x1ca   :  { %4704 = vmatprep.subr.bf16.mxu1 %v7433_v15 }
 0x1cd   :  { %4706 = vmatpush1.bf16.msra.mxu1 %v7434_v41 }
 0x1ce   :  { %4708 = vmatprep.subr.bf16.mxu1 %v7435_v51 }
 0x1d1   :  { %4710 = vmatpush1.bf16.msra.mxu1 %v7436_v36 }
 0x1d2   :  { %4712 = vmatprep.subr.bf16.mxu1 %v7437_v48 }
 0x1d5   :  { %4714 = vmatpush1.bf16.msra.mxu1 %v7438_v6 }
 0x1d6   :  { %4716 = vmatprep.subr.bf16.mxu1 %v7439_v0 }
 0x1d9   :  { %4718 = vmatpush1.bf16.msra.mxu1 %v7440_v34 }
 0x1da   :  { %4720 = vmatprep.subr.bf16.mxu1 %v7441_v30 }
 0x1dd   :  { %4722 = vmatpush1.bf16.msra.mxu1 %v7442_v45 }
 0x1de   :  { %4724 = vmatprep.subr.bf16.mxu1 %v7443_v44 }
 0x1e1   :  { %4726 = vmatpush1.bf16.msra.mxu1 %v7444_v3 }
 0x1e2   :  { %4728 = vmatprep.subr.bf16.mxu1 %v7445_v54 }
 0x1e5   :  { %4730 = vmatpush1.bf16.msra.mxu1 %v7446_v55 }
 0x1e6   :  { %4732 = vmatprep.subr.bf16.mxu1 %v7447_v23  ;;  %v7469_v23 = vld [vmem:[#allocation21_spill] sm:$0xff] }
 0x1e9   :  { %4734 = vmatpush1.bf16.msra.mxu1 %v7448_v42  ;;  %v7459_v42 = vld [vmem:[#allocation91_spill] sm:$0xff] }
 0x1ea   :  { %4736 = vmatprep.subr.bf16.mxu1 %v7449_v56  ;;  %v7460_v56 = vld [vmem:[#allocation92_spill] sm:$0xff] }
 0x1ed   :  { %4738 = vmatpush1.bf16.msra.mxu1 %v7450_v2  ;;  %v7461_v2 = vld [vmem:[#allocation93_spill] sm:$0xff] }
 0x1ee   :  { %4740 = vmatprep.subr.bf16.mxu1 %v7451_v38 }
 0x1f1   :  { %4742 = vmatpush1.bf16.msra.mxu1 %v7452_v17  ;;  %v7462_v17 = vand.u32 4294901760, %v7371_v19  ;;  %v7470_v19 = vand.u32 4294901760, %v5791_v13 }
 0x1f2   :  { %4744 = vmatprep.subr.bf16.mxu1 %v7453_v57  ;;  %v7463_v57 = vand.u32 4294901760, %v7372_v21  ;;  %v7471_v21 = vand.u32 4294901760, %v5793_v46 }
 0x1f4   :  { %v4763_v38 = vpack.c.bf16 %v7463_v57, %v7462_v17  ;;  %v4769_v17 = vpack.c.bf16 %v7471_v21, %v7470_v19  ;;  %v7472_v57 = vld [vmem:[#allocation18_spill] sm:$0xff] }
 0x1f5   :  { %4746 = vmatpush1.bf16.msra.mxu1 %v7454_v12  ;;  %v7464_v12 = vld [vmem:[#allocation95_spill] sm:$0xff]  ;;  %v7485_v21 = vld [vmem:[#allocation38_spill] sm:$0xff] }
 0x1f6   :  { %4748 = vmatprep.subr.bf16.mxu1 %v7455_v10  ;;  %v7465_v10 = vand.u32 4294901760, %v7377_v27  ;;  %v7473_v27 = vld [vmem:[#allocation30_spill] sm:$0xff] }
 0x1f9   :  { %4750 = vmatpush1.bf16.msra.mxu1 %v7456_v58  ;;  %v7466_v58 = vand.u32 4294901760, %v7378_v50  ;;  %v7474_v50 = vand.u32 4294901760, %v7473_v27 }
 0x1fa   :  { %4752 = vmatprep.subr.bf16.mxu1 %v7457_v29 }
 0x1fb   :  { %v4765_v29 = vpack.c.bf16 %v7466_v58, %v7465_v10  ;;  %v7475_v10 = vld [vmem:[#allocation31_spill] sm:$0xff] }
 0x1fd   :  { %4754 = vmatpush1.bf16.msra.mxu1 %v7458_v32  ;;  %v7467_v32 = vand.u32 4294901760, %v5786_v24  ;;  %v7477_v24 = vld [vmem:[#allocation33_spill] sm:$0xff] }
 0x1fe   :  { %4756 = vmatprep.subr.bf16.mxu1 %v7459_v42  ;;  %v7468_v42 = vand.u32 4294901760, %v5789_v5  ;;  %v7478_v5 = vand.u32 4294901760, %v7477_v24 }
 0x201   :  { %4758 = vmatpush1.bf16.msra.mxu1 %v7460_v56  ;;  %v4767_v56 = vpack.c.bf16 %v7468_v42, %v7467_v32  ;;  %v7479_v32 = vld [vmem:[#allocation35_spill] sm:$0xff] }
 0x202   :  { %4760 = vmatprep.subr.bf16.mxu1 %v7461_v2  ;;  %v7480_v42 = vand.u32 4294901760, %v7479_v32  ;;  %v7487_v2 = vld [vmem:[#allocation39_spill] sm:$0xff] }
 0x203   :  { %v7488_v27 = vand.u32 4294901760, %v7487_v2  ;;  %v7495_v32 = vld [vmem:[#allocation43_spill] sm:$0xff]  ;;  %v7499_v2 = vld [vmem:[#allocation48_spill] sm:$0xff] }
 0x205   :  { %4762 = vmatpush1.bf16.msra.mxu1 %v7464_v12  ;;  %v7483_v12 = vld [vmem:[#allocation37_spill] sm:$0xff] }
 0x206   :  { %4764 = vmatprep.subr.bf16.mxu1 %v4763_v38  ;;  %v7476_v38 = vand.u32 4294901760, %v7475_v10  ;;  %v7484_v46 = vand.u32 4294901760, %v7483_v12  ;;  %v7491_v10 = vld [vmem:[#allocation41_spill] sm:$0xff]  ;;  %v7497_v12 = vand.u32 4294901760, %v7394_v37 }
 0x208   :  { %2942 = vmatmul.mubr.f32.vlgmr.msra.gmra.mrb[8].mxu1 %v7469_v23  ;;  %v4771_v58 = vpack.c.bf16 %v7476_v38, %v7474_v50  ;;  %v4773_v23 = vpack.c.bf16 %v7480_v42, %v7478_v5  ;;  %v7489_v50 = vld [vmem:[#allocation40_spill] sm:$0xff]  ;;  %v7492_v38 = vand.u32 4294901760, %v7491_v10  ;;  %v7493_v5 = vld [vmem:[#allocation42_spill] sm:$0xff]  ;;  %v7496_v42 = vand.u32 4294901760, %v7495_v32 }
 0x209   :  { %4766 = vmatpush1.bf16.msra.mxu1 %v4765_v29  ;;  %3205 = vmatprep.mubr.f32.mxu1 %v7472_v57  ;;  %v7481_v29 = vld [vmem:[#allocation36_spill] sm:$0xff] }
 0x20a   :  { %4768 = vmatprep.subr.bf16.mxu1 %v4767_v56  ;;  %v7482_v13 = vand.u32 4294901760, %v7481_v29  ;;  %v7486_v56 = vand.u32 4294901760, %v7485_v21 }
 0x20c   :  { %v4775_v19 = vpack.c.bf16 %v7484_v46, %v7482_v13  ;;  %v4777_v55 = vpack.c.bf16 %v7488_v27, %v7486_v56  ;;  %v7500_v46 = vand.u32 4294901760, %v7499_v2  ;;  %v7503_v27 = vld [vmem:[#allocation50_spill] sm:$0xff]  ;;  %v7517_v2 = vld [vmem:[#allocation60_spill] sm:$0xff] }
 0x20d   :  { %4770 = vmatpush1.bf16.msra.mxu1 %v4769_v17  ;;  %v7490_v17 = vand.u32 4294901760, %v7489_v50  ;;  %v7505_v50 = vld [vmem:[#allocation51_spill] sm:$0xff] }
 0x20e   :  { %4772 = vmatprep.subr.bf16.mxu1 %v4771_v58  ;;  %v7494_v58 = vand.u32 4294901760, %v7493_v5  ;;  %v7509_v5 = vld [vmem:[#allocation54_spill] sm:$0xff] }
 0x20f   :  { %v4779_v24 = vpack.c.bf16 %v7492_v38, %v7490_v17  ;;  %v7506_v17 = vand.u32 4294901760, %v7505_v50  ;;  %v7507_v38 = vld [vmem:[#allocation53_spill] sm:$0xff]  ;;  %v7510_v37 = vand.u32 4294901760, %v7509_v5  ;;  %v7522_v50 = vand.u32 4294901760, %v7408_v53 }
 0x210   :  { %v4781_v29 = vpack.c.bf16 %v7496_v42, %v7494_v58  ;;  %v7513_v42 = vld [vmem:[#allocation57_spill] sm:$0xff]  ;;  %v7531_v53 = vand.u32 4294901760, %v7415_v28  ;;  %v7539_v28 = vand.u32 4294901760, %v5919_v43  ;;  %v7547_v43 = vand.u32 4294901760, %v5945_v7 }
 0x211   :  { %4774 = vmatpush1.bf16.msra.mxu1 %v4773_v23  ;;  %v7498_v23 = vand.u32 4294901760, %v7395_v47  ;;  %v7511_v47 = vld [vmem:[#allocation56_spill] sm:$0xff]  ;;  %v7554_v7 = vand.u32 4294901760, %v7364_v26  ;;  %v7559_v26 = vld [vmem:[#allocation61_spill] sm:$0xff] }
 0x212   :  { %4776 = vmatprep.subr.bf16.mxu1 %v4775_v19  ;;  %v7501_v19 = vld [vmem:[#allocation49_spill] sm:$0xff]  ;;  %v7512_v32 = vand.u32 4294901760, %v7511_v47  ;;  %v7528_v47 = vld [vmem:[#allocation72_spill] sm:$0xff] }
 0x213   :  { %v4783_v13 = vpack.c.bf16 %v7498_v23, %v7497_v12  ;;  %v7502_v21 = vand.u32 4294901760, %v7501_v19  ;;  %v7515_v23 = vld [vmem:[#allocation59_spill] sm:$0xff] }
 0x215   :  { %4778 = vmatpush1.bf16.msra.mxu1 %v4777_v55  ;;  %v4785_v56 = vpack.c.bf16 %v7502_v21, %v7500_v46  ;;  %v7504_v55 = vand.u32 4294901760, %v7503_v27  ;;  %v7518_v46 = vand.u32 4294901760, %v7517_v2  ;;  %v7519_v21 = vand.u32 4294901760, %v7406_v14 }
 0x216   :  { %4780 = vmatprep.subr.bf16.mxu1 %v4779_v24  ;;  %v7508_v24 = vand.u32 4294901760, %v7507_v38  ;;  %v7524_v38 = vand.u32 4294901760, %v7410_v31  ;;  %v7529_v14 = vand.u32 4294901760, %v7528_v47  ;;  %v7533_v31 = vand.u32 4294901760, %v7417_v1 }
 0x217   :  { %v4787_v10 = vpack.c.bf16 %v7506_v17, %v7504_v55  ;;  %v7523_v17 = vand.u32 4294901760, %v7409_v18  ;;  %v7532_v18 = vand.u32 4294901760, %v7416_v20  ;;  %v7542_v1 = vand.u32 4294901760, %v7348_v33 }
 0x218   :  { %v4789_v58 = vpack.c.bf16 %v7510_v37, %v7508_v24  ;;  %v7525_v24 = vand.u32 4294901760, %v7411_v61  ;;  %v7526_v37 = vld [vmem:[#allocation71_spill] sm:$0xff]  ;;  %v7534_v61 = vand.u32 4294901760, %v7338_v9  ;;  %v7543_v9 = vand.u32 4294901760, %v7350_v40 }
 0x219   :  { %4782 = vmatpush1.bf16.msra.mxu1 %v4781_v29  ;;  %v7514_v29 = vand.u32 4294901760, %v7513_v42  ;;  %v7530_v42 = vand.u32 4294901760, %v7414_v35  ;;  %v7538_v35 = vand.u32 4294901760, %v7344_v59  ;;  %v7546_v59 = vand.u32 4294901760, %v5943_v39 }
 0x21a   :  { %4784 = vmatprep.subr.bf16.mxu1 %v4783_v13  ;;  %v7516_v13 = vand.u32 4294901760, %v7515_v23  ;;  %v4799_v5 = vpack.c.bf16 %v7525_v24, %v7524_v38  ;;  %v7535_v23 = vld [vmem:[#allocation81_spill] sm:$0xff]  ;;  %v7549_v33 = vand.u32 4294901760, %v5954_v16  ;;  %v7550_v40 = vand.u32 4294901760, %v5974_v8 }
 0x21b   :  { %v4791_v12 = vpack.c.bf16 %v7514_v29, %v7512_v32  ;;  %v4803_v29 = vpack.c.bf16 %v7531_v53, %v7530_v42  ;;  %v7553_v39 = vand.u32 4294901760, %v7363_v11  ;;  %v7557_v8 = vld [vmem:[#allocation17_spill] sm:$0xff]  ;;  %v7560_v11 = vld [vmem:[#allocation64_spill] sm:$0xff] }
 0x21c   :  { %v4793_v19 = vpack.c.bf16 %v7518_v46, %v7516_v13  ;;  %v7536_v13 = vand.u32 4294901760, %v7535_v23  ;;  %v7537_v46 = vand.u32 4294901760, %v5913_v60  ;;  %v7545_v60 = vand.u32 4294901760, %v5938_v49 }
 0x21d   :  { %4786 = vmatpush1.bf16.msra.mxu1 %v4785_v56  ;;  %v7520_v56 = vld [vmem:[#allocation63_spill] sm:$0xff]  ;;  %v7552_v49 = vand.u32 4294901760, %v5981_v62 }
 0x21e   :  { %4788 = vmatprep.subr.bf16.mxu1 %v4787_v10  ;;  %v7521_v27 = vand.u32 4294901760, %v7520_v56  ;;  %v4797_v10 = vpack.c.bf16 %v7523_v17, %v7522_v50  ;;  %v4807_v2 = vpack.c.bf16 %v7536_v13, %v7534_v61  ;;  %v4817_v17 = vpack.c.bf16 %v7547_v43, %v7546_v59  ;;  %v7570_v61 = vld [vmem:[#allocation90_spill] sm:$0xff] }
 0x220   :  { %v4795_v55 = vpack.c.bf16 %v7521_v27, %v7519_v21  ;;  %v7540_v21 = vld [vmem:[#allocation85_spill] sm:$0xff]  ;;  %v4813_v27 = vpack.c.bf16 %v7543_v9, %v7542_v1  ;;  %v7572_v1 = vld [vmem:[#allocation92_spill] sm:$0xff] }
 0x221   :  { %4790 = vmatpush1.bf16.msra.mxu1 %v4789_v58  ;;  %v7527_v58 = vand.u32 4294901760, %v7526_v37  ;;  %v7541_v20 = vand.u32 4294901760, %v7540_v21  ;;  %v7555_v37 = vld [vmem:[#allocation98_spill] sm:$0xff] }
 0x222   :  { %4792 = vmatprep.subr.bf16.mxu1 %v4791_v12  ;;  %v4805_v12 = vpack.c.bf16 %v7533_v31, %v7532_v18  ;;  %v103_v31 = vld [vmem:[#allocation2 + $0x220] sm:$0xff] }
 0x223   :  { %v4801_v32 = vpack.c.bf16 %v7529_v14, %v7527_v58  ;;  %v4811_v56 = vpack.c.bf16 %v7541_v20, %v7539_v28 }
 0x225   :  { %4794 = vmatpush1.bf16.msra.mxu1 %v4793_v19  ;;  %v4809_v19 = vpack.c.bf16 %v7538_v35, %v7537_v46  ;;  %v7571_v35 = vld [vmem:[#allocation91_spill] sm:$0xff] }
 0x226   :  { %4796 = vmatprep.subr.bf16.mxu1 %v4795_v55  ;;  %v7544_v55 = vand.u32 4294901760, %v5936_v25  ;;  %v7551_v25 = vand.u32 4294901760, %v5977_v22  ;;  %v7558_v22 = vld [vmem:[#allocation58_spill] sm:$0xff] }
 0x228   :  { %v4815_v50 = vpack.c.bf16 %v7545_v60, %v7544_v55  ;;  %v4821_v24 = vpack.c.bf16 %v7551_v25, %v7550_v40  ;;  %v7574_v40 = vld [vmem:[#allocation95_spill] sm:$0xff] }
 0x229   :  { %4798 = vmatpush1.bf16.msra.mxu1 %v4797_v10  ;;  %v7548_v10 = vand.u32 4294901760, %v5949_v4  ;;  %v7556_v4 = vand.u32 4294901760, %v7555_v37 }
 0x22a   :  { %4800 = vmatprep.subr.bf16.mxu1 %v4799_v5  ;;  %v4823_v5 = vpack.c.bf16 %v7553_v39, %v7552_v49 }
 0x22b   :  { %v4819_v38 = vpack.c.bf16 %v7549_v33, %v7548_v10  ;;  %v4825_v58 = vpack.c.bf16 %v7556_v4, %v7554_v7 }
 0x22d   :  { %4802 = vmatpush1.bf16.msra.mxu1 %v4801_v32  ;;  %v7569_v32 = vld [vmem:[#allocation89_spill] sm:$0xff] }
 0x22e   :  { %4804 = vmatprep.subr.bf16.mxu1 %v4803_v29 }
 0x231   :  { %4806 = vmatpush1.bf16.msra.mxu1 %v4805_v12  ;;  %v105_v12 = vld [vmem:[#allocation2 + $0x230] sm:$0xff] }
 0x232   :  { %4808 = vmatprep.subr.bf16.mxu1 %v4807_v2  ;;  %v3360_v2 = vand.u32 4294901760, %v103_v31  ;;  %v3364_v46 = vand.u32 4294901760, %v105_v12 }
 0x234   :  { %v6783_v9 = vsub.f32 %v103_v31, %v3360_v2  ;;  %v7579_v31 = vld [vmem:[#allocation12_spill] sm:$0xff] }
 0x235   :  { %4810 = vmatpush1.bf16.msra.mxu1 %v4809_v19 }
 0x236   :  { %4812 = vmatprep.subr.bf16.mxu1 %v4811_v56  ;;  %v3466_v49 = vand.u32 4294901760, %v6783_v9 }
 0x239   :  { %4814 = vmatpush1.bf16.msra.mxu1 %v4813_v27  ;;  %v6785_v27 = vsub.f32 %v105_v12, %v3364_v46 }
 0x23a   :  { %4816 = vmatprep.subr.bf16.mxu1 %v4815_v50  ;;  %v7573_v50 = vld [vmem:[#allocation93_spill] sm:$0xff] }
 0x23b   :  { %v3478_v39 = vand.u32 4294901760, %v6785_v27 }
 0x23d   :  { %4818 = vmatpush1.bf16.msra.mxu1 %v4817_v17  ;;  %v4929_v12 = vpack.c.bf16 %v3478_v39, %v3466_v49 }
 0x23e   :  { %4820 = vmatprep.subr.bf16.mxu1 %v4819_v38 }
 0x241   :  { %4822 = vmatpush1.bf16.msra.mxu1 %v4821_v24 }
 0x242   :  { %4824 = vmatprep.subr.bf16.mxu1 %v4823_v5 }
 0x245   :  { %4826 = vmatpush1.bf16.msra.mxu1 %v4825_v58  ;;  %v4897_v58 = vpack.c.bf16 %v3364_v46, %v3360_v2 }
 0x246   :  { %4828 = vmatprep.subr.bf16.mxu1 %v7430_v52  ;;  %v7561_v52 = vld [vmem:[#allocation67_spill] sm:$0xff] }
 0x248   :  { %3207 = vmatmul.mubr.f32.vlgmr.msra.gmra.mrb[8].mxu1 %v7557_v8 }
 0x249   :  { %4830 = vmatpush1.bf16.msra.mxu1 %v7431_v63  ;;  %3342 = vmatprep.mubr.f32.mxu1 %v7472_v57  ;;  %v7562_v63 = vld [vmem:[#allocation68_spill] sm:$0xff]  ;;  %v7568_v57 = vld [vmem:[#allocation87_spill] sm:$0xff] }
 0x24a   :  { %4832 = vmatprep.subr.bf16.mxu1 %v7433_v15  ;;  %v7563_v15 = vld [vmem:[#allocation73_spill] sm:$0xff] }
 0x24d   :  { %4834 = vmatpush1.bf16.msra.mxu1 %v7434_v41  ;;  %v7564_v41 = vld [vmem:[#allocation76_spill] sm:$0xff] }
 0x24e   :  { %4836 = vmatprep.subr.bf16.mxu1 %v7435_v51  ;;  %v7565_v51 = vld [vmem:[#allocation79_spill] sm:$0xff] }
 0x251   :  { %4838 = vmatpush1.bf16.msra.mxu1 %v7436_v36  ;;  %v100_v36 = vld [vmem:[#allocation2 + $0x208] sm:$0xff] }
 0x252   :  { %4840 = vmatprep.subr.bf16.mxu1 %v7437_v48  ;;  %v6740_v62 = vpop.f32.mrb[10].mxu0  ;;  %v102_v48 = vld [vmem:[#allocation2 + $0x218] sm:$0xff] }
 0x253   :  { %v6742_v16 = vpop.f32.mrb[11].mxu0 }
 0x255   :  { %4842 = vmatpush1.bf16.msra.mxu1 %v7438_v6  ;;  %v7566_v6 = vld [vmem:[#allocation82_spill] sm:$0xff] }
 0x256   :  { %4844 = vmatprep.subr.bf16.mxu1 %v7439_v0  ;;  %v7567_v0 = vld [vmem:[#allocation84_spill] sm:$0xff] }
 0x259   :  { %4846 = vmatpush1.bf16.msra.mxu1 %v7440_v34  ;;  %v3350_v34 = vand.u32 4294901760, %v100_v36 }
 0x25a   :  { %4848 = vmatprep.subr.bf16.mxu1 %v7441_v30  ;;  %v3354_v30 = vand.u32 4294901760, %v102_v48 }
 0x25b   :  { %v6764_v42 = vsub.f32 %v100_v36, %v3350_v34 }
 0x25c   :  { %v6766_v53 = vsub.f32 %v102_v48, %v3354_v30  ;;  %v6780_v56 = vpack.c.bf16 %v3354_v30, %v3350_v34 }
 0x25d   :  { %4850 = vmatpush1.bf16.msra.mxu1 %v7442_v45  ;;  %v99_v45 = vld [vmem:[#allocation2 + $0x200] sm:$0xff]  ;;  %v3436_v21 = vand.u32 4294901760, %v6764_v42 }
 0x25e   :  { %4852 = vmatprep.subr.bf16.mxu1 %v7443_v44  ;;  %v101_v44 = vld [vmem:[#allocation2 + $0x210] sm:$0xff]  ;;  %v3352_v47 = vand.u32 4294901760, %v99_v45  ;;  %v3448_v20 = vand.u32 4294901760, %v6766_v53  ;;  %v4907_v30 = vpack.c.bf16 %v6766_v53, %v6764_v42 }
 0x25f   :  { %v3356_v14 = vand.u32 4294901760, %v101_v44  ;;  %v3437_v59 = vsub.f32 %v6764_v42, %v3436_v21  ;;  %v7580_v42 = vld [vmem:[#allocation5_spill] sm:$0xff] }
 0x260   :  { %v6769_v23 = vsub.f32 %v99_v45, %v3352_v47  ;;  %v3449_v43 = vsub.f32 %v6766_v53, %v3448_v20  ;;  %v3897_v53 = vsub.s32 0, %v7580_v42 }
 0x261   :  { %4854 = vmatpush1.bf16.msra.mxu1 %v7444_v3  ;;  %v104_v3 = vld [vmem:[#allocation2 + $0x228] sm:$0xff]  ;;  %v6771_v13 = vsub.f32 %v101_v44, %v3356_v14  ;;  %v6798_v33 = vpack.c.bf16 %v3356_v14, %v3352_v47  ;;  %v3438_v5 = vand.u32 4294901760, %v3437_v59 }
 0x262   :  { %4856 = vmatprep.subr.bf16.mxu1 %v7445_v54  ;;  %v106_v54 = vld [vmem:[#allocation2 + $0x238] sm:$0xff]  ;;  %v3358_v29 = vand.u32 4294901760, %v104_v3  ;;  %v3442_v55 = vand.u32 4294901760, %v6769_v23  ;;  %v3450_v7 = vand.u32 4294901760, %v3449_v43 }
 0x263   :  { %v3362_v18 = vand.u32 4294901760, %v106_v54  ;;  %v3454_v60 = vand.u32 4294901760, %v6771_v13  ;;  %v4909_v45 = vpack.c.bf16 %v6771_v13, %v6769_v23 }
 0x264   :  { %v6774_v19 = vsub.f32 %v104_v3, %v3358_v29  ;;  %v3443_v25 = vsub.f32 %v6769_v23, %v3442_v55  ;;  %v7577_v3 = vld [vmem:[#allocation9_spill] sm:$0xff]  ;;  %v3901_v23 = vsub.s32 1, %v7580_v42 }
 0x265   :  { %4858 = vmatpush1.bf16.msra.mxu1 %v7558_v22  ;;  %v6776_v28 = vsub.f32 %v106_v54, %v3362_v18  ;;  %v6800_v38 = vpack.c.bf16 %v3362_v18, %v3358_v29  ;;  %v3455_v24 = vsub.f32 %v6771_v13, %v3454_v60  ;;  %v7575_v22 = vmov 0.0   ;;  %v7578_v29 = vld [vmem:[#allocation10_spill] sm:$0xff] }
 0x266   :  { %4860 = vmatprep.subr.bf16.mxu1 %v7559_v26  ;;  %v3460_v17 = vand.u32 4294901760, %v6774_v19  ;;  %v3444_v26 = vand.u32 4294901760, %v3443_v25  ;;  %v4913_v54 = vpack.c.bf16 %v6785_v27, %v6783_v9  ;;  %v4923_v18 = vpack.c.bf16 %v3448_v20, %v3436_v21 }
 0x267   :  { %v3472_v10 = vand.u32 4294901760, %v6776_v28  ;;  %v4911_v44 = vpack.c.bf16 %v6776_v28, %v6774_v19 }
 0x268   :  { %v3461_v37 = vsub.f32 %v6774_v19, %v3460_v17 }
 0x269   :  { %4862 = vmatpush1.bf16.msra.mxu1 %v7560_v11  ;;  %v3473_v4 = vsub.f32 %v6776_v28, %v3472_v10  ;;  %v3456_v11 = vand.u32 4294901760, %v3455_v24 }
 0x26a   :  { %4864 = vmatprep.subr.bf16.mxu1 %v7561_v52  ;;  %v3467_v52 = vsub.f32 %v6783_v9, %v3466_v49 }
 0x26b   :  { %v4901_v36 = vpack.c.bf16 %v3456_v11, %v3444_v26 }
 0x26c   :  { %v3468_v48 = vand.u32 4294901760, %v3467_v52 }
 0x26d   :  { %4866 = vmatpush1.bf16.msra.mxu1 %v7562_v63  ;;  %v3479_v63 = vsub.f32 %v6785_v27, %v3478_v39 }
 0x26e   :  { %4868 = vmatprep.subr.bf16.mxu1 %v7563_v15  ;;  %v4899_v15 = vpack.c.bf16 %v3450_v7, %v3438_v5 }
 0x271   :  { %4870 = vmatpush1.bf16.msra.mxu1 %v7564_v41  ;;  %v3462_v41 = vand.u32 4294901760, %v3461_v37 }
 0x272   :  { %4872 = vmatprep.subr.bf16.mxu1 %v7565_v51  ;;  %v3474_v51 = vand.u32 4294901760, %v3473_v4 }
 0x275   :  { %4874 = vmatpush1.bf16.msra.mxu1 %v7566_v6  ;;  %v4903_v6 = vpack.c.bf16 %v3474_v51, %v3462_v41 }
 0x276   :  { %4876 = vmatprep.subr.bf16.mxu1 %v7567_v0  ;;  %v7576_v0 = vld [vmem:[#allocation11_spill] sm:$0xff] }
 0x279   :  { %4878 = vmatpush1.bf16.msra.mxu1 %v7568_v57 }
 0x27a   :  { %4880 = vmatprep.subr.bf16.mxu1 %v7569_v32 }
 0x27d   :  { %4882 = vmatpush1.bf16.msra.mxu1 %v7570_v61  ;;  %v3893_v61 = vld [vmem:[%s6867_s4] sm:$0x3] }
 0x27e   :  { %4884 = vmatprep.subr.bf16.mxu1 %v7571_v35  ;;  %v3898_v13 = vrot.slane %v3893_v61, %v3897_v53  ;;  %v3902_v46 = vrot.slane %v3893_v61, %v3901_v23 }
 0x281   :  { %4886 = vmatpush1.bf16.msra.mxu1 %v7572_v1 }
 0x282   :  { %4888 = vmatprep.subr.bf16.mxu1 %v7573_v50 }
 0x285   :  { %4890 = vmatpush1.bf16.msra.mxu1 %v7574_v40 }
 0x286   :  { %4892 = vmatprep.subr.bf16.mxu1 %v6780_v56 }
 0x288   :  { %3344 = vmatmul.mubr.f32.vlgmr.msra.gmra.mrb[8].mxu1 %v7557_v8  ;;  %v3480_v8 = vand.u32 4294901760, %v3479_v63 }
 0x289   :  { %4894 = vmatpush1.bf16.msra.mxu1 %v6798_v33  ;;  %3422 = vmatprep.mubr.f32.mxu1 %v7575_v22 }
 0x28a   :  { %4896 = vmatprep.subr.bf16.mxu1 %v6800_v38  ;;  %v4905_v34 = vpack.c.bf16 %v3480_v8, %v3468_v48 }
 0x28d   :  { %4898 = vmatpush1.bf16.msra.mxu1 %v4897_v58 }
 0x28e   :  { %4900 = vmatprep.subr.bf16.mxu1 %v4899_v15 }
 0x290   :  { %3428 = vmatmul.mubr.f32.vlgmr.msra.gmra.mrb[8].mxu1 %v7576_v0 }
 0x291   :  { %4902 = vmatpush1.bf16.msra.mxu1 %v4901_v36  ;;  %3538 = vmatprep.mubr.f32.mxu1 %v7575_v22 }
 0x292   :  { %4904 = vmatprep.subr.bf16.mxu1 %v4903_v6 }
 0x295   :  { %4906 = vmatpush1.bf16.msra.mxu1 %v4905_v34 }
 0x296   :  { %4908 = vmatprep.subr.bf16.mxu1 %v4907_v30 }
 0x298   :  { %3540 = vmatmul.mubr.f32.vlgmr.msra.gmra.mrb[8].mxu1 %v7577_v3 }
 0x299   :  { %4910 = vmatpush1.bf16.msra.mxu1 %v4909_v45  ;;  %3626 = vmatprep.mubr.f32.mxu1 %v7575_v22 }
 0x29a   :  { %4912 = vmatprep.subr.bf16.mxu1 %v4911_v44 }
 0x29b   :  { %v2061_v57 = vpop.f32.mrb[6].mxu1 }
 0x29c   :  { %v4941_v47 = vadd.f32 %v6740_v62, %v2061_v57  ;;  %v2063_v14 = vpop.f32.mrb[7].mxu1  ;;  %v4925_v62 = vpack.c.bf16 %v3454_v60, %v3442_v55 }
 0x29d   :  { %v4943_v32 = vadd.f32 %v6742_v16, %v2063_v14  ;;  %4914 = vmatpush1.bf16.msra.mxu1 %v4913_v54  ;;  %v4927_v16 = vpack.c.bf16 %v3472_v10, %v3460_v17 }
 0x29e   :  { %4916 = vmatprep.subr.bf16.mxu1 %v6780_v56 }
 0x2a0   :  { %3629 = vmatmul.mubr.f32.vlgmr.msra.gmra.mrb[8].mxu1 %v7578_v29 }
 0x2a1   :  { %4918 = vmatpush1.bf16.msra.mxu1 %v6798_v33  ;;  %3707 = vmatprep.mubr.f32.mxu1 %v7575_v22 }
 0x2a2   :  { %4920 = vmatprep.subr.bf16.mxu1 %v6800_v38 }
 0x2a5   :  { %4922 = vmatpush1.bf16.msra.mxu1 %v4897_v58 }
 0x2a6   :  { %4924 = vmatprep.subr.bf16.mxu1 %v4923_v18 }
 0x2a8   :  { %3711 = vmatmul.mubr.f32.vlgmr.msra.gmra.mrb[8].mxu1 %v7579_v31 }
 0x2a9   :  { %4926 = vmatpush1.bf16.msra.mxu1 %v4925_v62  ;;  %3805 = vmatprep.mubr.f32.mxu1 %v7575_v22 }
 0x2aa   :  { %4928 = vmatprep.subr.bf16.mxu1 %v4927_v16 }
 0x2ad   :  { %4930 = vmatpush1.bf16.msra.mxu1 %v4929_v12 }
 0x2ae   :  { %4932 = vmatprep.subr.bf16.mxu1 %v6780_v56 }
 0x2b0   :  { %3807 = vmatmul.mubr.f32.vlgmr.msra.gmra.mrb[8].mxu1 %v7577_v3 }
 0x2b1   :  { %4934 = vmatpush1.bf16.msra.mxu1 %v6798_v33  ;;  %3885 = vmatprep.mubr.f32.mxu1 %v7575_v22 }
 0x2b2   :  { %4936 = vmatprep.subr.bf16.mxu1 %v6800_v38 }
 0x2b5   :  { %4938 = vmatpush1.bf16.msra.mxu1 %v4897_v58 }
 0x2b8   :  { %3887 = vmatmul.mubr.f32.vlgmr.msra.gmra.mrb[8].mxu1 %v7577_v3 }
 0x38b   :  { %v3888_v2 = vpop.f32.mrb[8].mxu1 }
 0x38c   :  { %v4942_v35 = vadd.f32 %v4941_v47, %v3888_v2  ;;  %v3890_v19 = vpop.f32.mrb[9].mxu1 }
 0x38d   :  { %v4944_v28 = vadd.f32 %v4943_v32, %v3890_v19 }
 0x38e   :  { %v3905_v21 = vadd.f32 %v4942_v35, %v3898_v13 }
 0x38f   :  { %v3906_v20 = vadd.f32 %v4944_v28, %v3902_v46 }
 0x391   :  { %v3909_v56 = vcombine.low %v3905_v21, %v3906_v20 }
 0x393   :  { %3924 = vst.sshfl [vmem:[%s6868_s5] sm:$0x33 pattern:$0x76325410] %v3909_v56 }
 0x394   :  { %3923 = vsyncpa [#allocation3], 1 }

</bundles_post_ra>
